<compile_context>
chip_gen: v7x
topology: tpu7x:2x2x1
jax: 0.10.0
libtpu: 0.0.40
codegen_flags: <defaults>
</compile_context>

<pallas_src>
import functools

import jax
import jax.numpy as jnp
from jax.experimental import pallas as pl
from jax.experimental.pallas import tpu as pltpu


def autopad(k, p=None):
    if p is None:
        p = k // 2 if isinstance(k, int) else [x // 2 for x in k]
    return p


def _round_up(v, m):
    return ((v + m - 1) // m) * m


def _conv_bn_silu_kernel(x_ref, w_ref, scale_ref, bias_ref, o_ref, *,
                         k, s, Ho, Wo):
    # x_ref:     (1, 1, Hp, Wp, c1g)  bf16 padded activation (one image, one group)
    # w_ref:     (1, k, k, c1g, c2p)  bf16 weights, c2p = c2g padded to mult of 128
    # scale_ref: (1, 1, c2p)          f32 folded-BN scale
    # bias_ref:  (1, 1, c2p)          f32 folded-BN bias
    # o_ref:     (1, 1, Ho*Wo, c2p)   f32 output
    x = x_ref[0, 0]                                   # (Hp, Wp, c1g) bf16
    c1g = x.shape[-1]

    acc = None
    for kh in range(k):
        for kw in range(k):
            # (kh, kw)-shifted patch of the padded input, strided by s.
            patch = jax.lax.slice(
                x,
                (kh, kw, 0),
                (kh + (Ho - 1) * s + 1, kw + (Wo - 1) * s + 1, c1g),
                (s, s, 1))                            # (Ho, Wo, c1g)
            a = patch.reshape(Ho * Wo, c1g)
            d = jnp.dot(a, w_ref[0, kh, kw],
                        preferred_element_type=jnp.float32)
            acc = d if acc is None else acc + d       # (Ho*Wo, c2p) f32

    y = acc * scale_ref[0] + bias_ref[0]              # folded BatchNorm (eval mode)
    o_ref[0, 0] = (y * jax.nn.sigmoid(y)).astype(o_ref.dtype)   # SiLU


def conv_bn_silu(x, weight, gamma, beta, running_mean, running_var,
                 k=1, s=1, p=None, g=1, eps=1e-5):
    """Conv.forward: SiLU(BatchNorm2d(Conv2d(x))) with bias=False.

    x: (N, C1, H, W) NCHW; weight: (C2, C1//g, k, k) OIHW (PyTorch layout).
    """
    assert isinstance(k, int), "only square integer kernels supported"
    p = autopad(k, p)
    N, C1, H, W = x.shape
    C2 = weight.shape[0]
    assert C1 % g == 0 and C2 % g == 0, "channels must divide groups"
    c1g, c2g = C1 // g, C2 // g
    Hp, Wp = H + 2 * p, W + 2 * p
    Ho = (H + 2 * p - k) // s + 1
    Wo = (W + 2 * p - k) // s + 1

    # Lane-dense output-channel tile (multiple of 128).
    c2p = max(128, _round_up(c2g, 128))

    # Fold BatchNorm (eval-mode running stats) into an affine.
    scale = gamma / jnp.sqrt(running_var + eps)          # (C2,)
    bias = beta - running_mean * scale                    # (C2,)
    scale_g = jnp.pad(scale.reshape(g, c2g),
                      ((0, 0), (0, c2p - c2g))).reshape(g, 1, c2p)
    bias_g = jnp.pad(bias.reshape(g, c2g),
                     ((0, 0), (0, c2p - c2g))).reshape(g, 1, c2p)

    # Activations: NCHW -> (g, N, Hp, Wp, c1g), bf16 for the MXU.
    xp = jnp.pad(x, ((0, 0), (0, 0), (p, p), (p, p)))
    x_g = xp.reshape(N, g, c1g, Hp, Wp).transpose(1, 0, 3, 4, 2)
    x_g = x_g.astype(jnp.bfloat16)

    # Weights: OIHW -> (g, k, k, c1g, c2p), bf16, zero-padded out channels.
    w_g = weight.reshape(g, c2g, c1g, k, k).transpose(0, 3, 4, 2, 1)
    w_g = jnp.pad(w_g, ((0, 0), (0, 0), (0, 0), (0, 0), (0, c2p - c2g)))
    w_g = w_g.astype(jnp.bfloat16)

    kernel = functools.partial(_conv_bn_silu_kernel, k=k, s=s, Ho=Ho, Wo=Wo)

    out = pl.pallas_call(
        kernel,
        out_shape=jax.ShapeDtypeStruct((g, N, Ho * Wo, c2p), jnp.float32),
        grid_spec=pltpu.PrefetchScalarGridSpec(
            num_scalar_prefetch=0,
            grid=(g, N),
            in_specs=[
                pl.BlockSpec((1, 1, Hp, Wp, c1g), lambda gi, n: (gi, n, 0, 0, 0)),
                pl.BlockSpec((1, k, k, c1g, c2p), lambda gi, n: (gi, 0, 0, 0, 0)),
                pl.BlockSpec((1, 1, c2p), lambda gi, n: (gi, 0, 0)),
                pl.BlockSpec((1, 1, c2p), lambda gi, n: (gi, 0, 0)),
            ],
            out_specs=pl.BlockSpec((1, 1, Ho * Wo, c2p),
                                   lambda gi, n: (gi, n, 0, 0)),
        ),
        compiler_params=pltpu.CompilerParams(
            dimension_semantics=("parallel", "parallel"),
            vmem_limit_bytes=64 * 1024 * 1024),
    )(x_g, w_g, scale_g, bias_g)

    # (g, N, Ho*Wo, c2p) -> NCHW, dropping padded output channels.
    # TODO(synk): if the consumer accepts NHWC, return out.reshape(g,N,Ho,Wo,c2p)
    # sliced/merged without the final NCHW transpose.
    out = out.reshape(g, N, Ho, Wo, c2p)[..., :c2g]
    out = out.transpose(1, 0, 4, 2, 3).reshape(N, C2, Ho, Wo)
    return out


def _reference(x, weight, gamma, beta, mean, var, k, s, p, g, eps=1e-5):
    p = autopad(k, p)
    y = jax.lax.conv_general_dilated(
        x, weight, window_strides=(s, s), padding=[(p, p), (p, p)],
        dimension_numbers=("NCHW", "OIHW", "NCHW"), feature_group_count=g)
    sc = (gamma / jnp.sqrt(var + eps)).reshape(1, -1, 1, 1)
    bi = (beta - mean * gamma / jnp.sqrt(var + eps)).reshape(1, -1, 1, 1)
    y = y * sc + bi
    return y * jax.nn.sigmoid(y)


if __name__ == "__main__":
    key = jax.random.PRNGKey(0)
    k1, k2, k3, k4, k5, k6 = jax.random.split(key, 6)

    # Conv(c1=4, c2=8, k=3, s=1) on a (2, 4, 16, 16) NCHW input.
    N, C1, H, W = 2, 4, 16, 16
    C2, k, s, g = 8, 3, 1, 1

    x = jax.random.normal(k1, (N, C1, H, W), jnp.float32)
    weight = jax.random.normal(k2, (C2, C1 // g, k, k), jnp.float32) * 0.1
    gamma = 1.0 + 0.1 * jax.random.normal(k3, (C2,), jnp.float32)
    beta = 0.1 * jax.random.normal(k4, (C2,), jnp.float32)
    running_mean = 0.1 * jax.random.normal(k5, (C2,), jnp.float32)
    running_var = jax.nn.softplus(jax.random.normal(k6, (C2,), jnp.float32)) + 0.5

    conv_fn = jax.jit(lambda *a: conv_bn_silu(*a, k=k, s=s, g=g))
    out = conv_fn(x, weight, gamma, beta, running_mean, running_var)
    out = jax.block_until_ready(out)

    ref = _reference(x, weight, gamma, beta, running_mean, running_var,
                     k, s, None, g)
    assert out.shape == (N, C2, H, W), out.shape
    # Tolerance loosened vs. f32 reference: MXU operands are bf16 (f32 accum).
    assert jnp.allclose(out, ref, atol=2e-2, rtol=2e-2), \
        float(jnp.max(jnp.abs(out - ref)))
    print("KERNEL_OK")
</pallas_src>

<mosaic_0001>
module attributes {stable_mosaic.version = 11 : i64} {
  func.func @_conv_bn_silu_kernel(%arg0: i32, %arg1: i32, %arg2: memref<1x1x18x18x4xbf16, #tpu.memory_space<vmem>>, %arg3: memref<1x3x3x4x128xbf16, #tpu.memory_space<vmem>>, %arg4: memref<1x1x128xf32, #tpu.memory_space<vmem>>, %arg5: memref<1x1x128xf32, #tpu.memory_space<vmem>>, %arg6: memref<1x1x256x128xf32, #tpu.memory_space<vmem>>) attributes {dimension_semantics = [#tpu.dimension_semantics<parallel>, #tpu.dimension_semantics<parallel>], iteration_bounds = array<i64: 1, 2>, scalar_prefetch = 0 : i64, scratch_operands = 0 : i64, tpu.core_type = #tpu.core_type<tc>, window_params = [{transform_indices = @transform_0, window_bounds = array<i64: 1, 1, 18, 18, 4>}, {transform_indices = @transform_1, window_bounds = array<i64: 1, 3, 3, 4, 128>}, {transform_indices = @transform_2, window_bounds = array<i64: 1, 1, 128>}, {transform_indices = @transform_3, window_bounds = array<i64: 1, 1, 128>}, {transform_indices = @transform_4, window_bounds = array<i64: 1, 1, 256, 128>}]} {
    %c0 = arith.constant 0 : index
    %c0_0 = arith.constant 0 : index
    %c0_1 = arith.constant 0 : index
    %c0_2 = arith.constant 0 : index
    %c0_3 = arith.constant 0 : index
    %0 = vector.load %arg2[%c0, %c0_0, %c0_1, %c0_2, %c0_3] : memref<1x1x18x18x4xbf16, #tpu.memory_space<vmem>>, vector<1x1x18x18x4xbf16>
    %1 = vector.shape_cast %0 : vector<1x1x18x18x4xbf16> to vector<18x18x4xbf16>
    %2 = vector.extract_strided_slice %1 {offsets = [0, 0, 0], sizes = [16, 16, 4], strides = [1, 1, 1]} : vector<18x18x4xbf16> to vector<16x16x4xbf16>
    %3 = vector.shape_cast %2 : vector<16x16x4xbf16> to vector<256x4xbf16>
    %c0_4 = arith.constant 0 : index
    %c0_5 = arith.constant 0 : index
    %c0_6 = arith.constant 0 : index
    %c0_7 = arith.constant 0 : index
    %c0_8 = arith.constant 0 : index
    %4 = vector.load %arg3[%c0_4, %c0_5, %c0_6, %c0_7, %c0_8] : memref<1x3x3x4x128xbf16, #tpu.memory_space<vmem>>, vector<1x1x1x4x128xbf16>
    %5 = vector.shape_cast %4 : vector<1x1x1x4x128xbf16> to vector<4x128xbf16>
    %cst = arith.constant dense<0.000000e+00> : vector<256x128xf32>
    %6 = tpu.matmul %3, %5, %cst {dimension_numbers = #tpu.dot_dimension_numbers<[1], [0], [0], [1], [0, 0, 1, 1], [], []>} : vector<256x4xbf16>, vector<4x128xbf16>, vector<256x128xf32> -> vector<256x128xf32>
    %7 = vector.extract_strided_slice %1 {offsets = [0, 1, 0], sizes = [16, 16, 4], strides = [1, 1, 1]} : vector<18x18x4xbf16> to vector<16x16x4xbf16>
    %8 = vector.shape_cast %7 : vector<16x16x4xbf16> to vector<256x4xbf16>
    %c0_9 = arith.constant 0 : index
    %c0_10 = arith.constant 0 : index
    %c1 = arith.constant 1 : index
    %c0_11 = arith.constant 0 : index
    %c0_12 = arith.constant 0 : index
    %9 = vector.load %arg3[%c0_9, %c0_10, %c1, %c0_11, %c0_12] : memref<1x3x3x4x128xbf16, #tpu.memory_space<vmem>>, vector<1x1x1x4x128xbf16>
    %10 = vector.shape_cast %9 : vector<1x1x1x4x128xbf16> to vector<4x128xbf16>
    %cst_13 = arith.constant dense<0.000000e+00> : vector<256x128xf32>
    %11 = tpu.matmul %8, %10, %cst_13 {dimension_numbers = #tpu.dot_dimension_numbers<[1], [0], [0], [1], [0, 0, 1, 1], [], []>} : vector<256x4xbf16>, vector<4x128xbf16>, vector<256x128xf32> -> vector<256x128xf32>
    %12 = arith.addf %6, %11 : vector<256x128xf32>
    %13 = vector.extract_strided_slice %1 {offsets = [0, 2, 0], sizes = [16, 16, 4], strides = [1, 1, 1]} : vector<18x18x4xbf16> to vector<16x16x4xbf16>
    %14 = vector.shape_cast %13 : vector<16x16x4xbf16> to vector<256x4xbf16>
    %c0_14 = arith.constant 0 : index
    %c0_15 = arith.constant 0 : index
    %c2 = arith.constant 2 : index
    %c0_16 = arith.constant 0 : index
    %c0_17 = arith.constant 0 : index
    %15 = vector.load %arg3[%c0_14, %c0_15, %c2, %c0_16, %c0_17] : memref<1x3x3x4x128xbf16, #tpu.memory_space<vmem>>, vector<1x1x1x4x128xbf16>
    %16 = vector.shape_cast %15 : vector<1x1x1x4x128xbf16> to vector<4x128xbf16>
    %cst_18 = arith.constant dense<0.000000e+00> : vector<256x128xf32>
    %17 = tpu.matmul %14, %16, %cst_18 {dimension_numbers = #tpu.dot_dimension_numbers<[1], [0], [0], [1], [0, 0, 1, 1], [], []>} : vector<256x4xbf16>, vector<4x128xbf16>, vector<256x128xf32> -> vector<256x128xf32>
    %18 = arith.addf %12, %17 : vector<256x128xf32>
    %19 = vector.extract_strided_slice %1 {offsets = [1, 0, 0], sizes = [16, 16, 4], strides = [1, 1, 1]} : vector<18x18x4xbf16> to vector<16x16x4xbf16>
    %20 = vector.shape_cast %19 : vector<16x16x4xbf16> to vector<256x4xbf16>
    %c0_19 = arith.constant 0 : index
    %c1_20 = arith.constant 1 : index
    %c0_21 = arith.constant 0 : index
    %c0_22 = arith.constant 0 : index
    %c0_23 = arith.constant 0 : index
    %21 = vector.load %arg3[%c0_19, %c1_20, %c0_21, %c0_22, %c0_23] : memref<1x3x3x4x128xbf16, #tpu.memory_space<vmem>>, vector<1x1x1x4x128xbf16>
    %22 = vector.shape_cast %21 : vector<1x1x1x4x128xbf16> to vector<4x128xbf16>
    %cst_24 = arith.constant dense<0.000000e+00> : vector<256x128xf32>
    %23 = tpu.matmul %20, %22, %cst_24 {dimension_numbers = #tpu.dot_dimension_numbers<[1], [0], [0], [1], [0, 0, 1, 1], [], []>} : vector<256x4xbf16>, vector<4x128xbf16>, vector<256x128xf32> -> vector<256x128xf32>
    %24 = arith.addf %18, %23 : vector<256x128xf32>
    %25 = vector.extract_strided_slice %1 {offsets = [1, 1, 0], sizes = [16, 16, 4], strides = [1, 1, 1]} : vector<18x18x4xbf16> to vector<16x16x4xbf16>
    %26 = vector.shape_cast %25 : vector<16x16x4xbf16> to vector<256x4xbf16>
    %c0_25 = arith.constant 0 : index
    %c1_26 = arith.constant 1 : index
    %c1_27 = arith.constant 1 : index
    %c0_28 = arith.constant 0 : index
    %c0_29 = arith.constant 0 : index
    %27 = vector.load %arg3[%c0_25, %c1_26, %c1_27, %c0_28, %c0_29] : memref<1x3x3x4x128xbf16, #tpu.memory_space<vmem>>, vector<1x1x1x4x128xbf16>
    %28 = vector.shape_cast %27 : vector<1x1x1x4x128xbf16> to vector<4x128xbf16>
    %cst_30 = arith.constant dense<0.000000e+00> : vector<256x128xf32>
    %29 = tpu.matmul %26, %28, %cst_30 {dimension_numbers = #tpu.dot_dimension_numbers<[1], [0], [0], [1], [0, 0, 1, 1], [], []>} : vector<256x4xbf16>, vector<4x128xbf16>, vector<256x128xf32> -> vector<256x128xf32>
    %30 = arith.addf %24, %29 : vector<256x128xf32>
    %31 = vector.extract_strided_slice %1 {offsets = [1, 2, 0], sizes = [16, 16, 4], strides = [1, 1, 1]} : vector<18x18x4xbf16> to vector<16x16x4xbf16>
    %32 = vector.shape_cast %31 : vector<16x16x4xbf16> to vector<256x4xbf16>
    %c0_31 = arith.constant 0 : index
    %c1_32 = arith.constant 1 : index
    %c2_33 = arith.constant 2 : index
    %c0_34 = arith.constant 0 : index
    %c0_35 = arith.constant 0 : index
    %33 = vector.load %arg3[%c0_31, %c1_32, %c2_33, %c0_34, %c0_35] : memref<1x3x3x4x128xbf16, #tpu.memory_space<vmem>>, vector<1x1x1x4x128xbf16>
    %34 = vector.shape_cast %33 : vector<1x1x1x4x128xbf16> to vector<4x128xbf16>
    %cst_36 = arith.constant dense<0.000000e+00> : vector<256x128xf32>
    %35 = tpu.matmul %32, %34, %cst_36 {dimension_numbers = #tpu.dot_dimension_numbers<[1], [0], [0], [1], [0, 0, 1, 1], [], []>} : vector<256x4xbf16>, vector<4x128xbf16>, vector<256x128xf32> -> vector<256x128xf32>
    %36 = arith.addf %30, %35 : vector<256x128xf32>
    %37 = vector.extract_strided_slice %1 {offsets = [2, 0, 0], sizes = [16, 16, 4], strides = [1, 1, 1]} : vector<18x18x4xbf16> to vector<16x16x4xbf16>
    %38 = vector.shape_cast %37 : vector<16x16x4xbf16> to vector<256x4xbf16>
    %c0_37 = arith.constant 0 : index
    %c2_38 = arith.constant 2 : index
    %c0_39 = arith.constant 0 : index
    %c0_40 = arith.constant 0 : index
    %c0_41 = arith.constant 0 : index
    %39 = vector.load %arg3[%c0_37, %c2_38, %c0_39, %c0_40, %c0_41] : memref<1x3x3x4x128xbf16, #tpu.memory_space<vmem>>, vector<1x1x1x4x128xbf16>
    %40 = vector.shape_cast %39 : vector<1x1x1x4x128xbf16> to vector<4x128xbf16>
    %cst_42 = arith.constant dense<0.000000e+00> : vector<256x128xf32>
    %41 = tpu.matmul %38, %40, %cst_42 {dimension_numbers = #tpu.dot_dimension_numbers<[1], [0], [0], [1], [0, 0, 1, 1], [], []>} : vector<256x4xbf16>, vector<4x128xbf16>, vector<256x128xf32> -> vector<256x128xf32>
    %42 = arith.addf %36, %41 : vector<256x128xf32>
    %43 = vector.extract_strided_slice %1 {offsets = [2, 1, 0], sizes = [16, 16, 4], strides = [1, 1, 1]} : vector<18x18x4xbf16> to vector<16x16x4xbf16>
    %44 = vector.shape_cast %43 : vector<16x16x4xbf16> to vector<256x4xbf16>
    %c0_43 = arith.constant 0 : index
    %c2_44 = arith.constant 2 : index
    %c1_45 = arith.constant 1 : index
    %c0_46 = arith.constant 0 : index
    %c0_47 = arith.constant 0 : index
    %45 = vector.load %arg3[%c0_43, %c2_44, %c1_45, %c0_46, %c0_47] : memref<1x3x3x4x128xbf16, #tpu.memory_space<vmem>>, vector<1x1x1x4x128xbf16>
    %46 = vector.shape_cast %45 : vector<1x1x1x4x128xbf16> to vector<4x128xbf16>
    %cst_48 = arith.constant dense<0.000000e+00> : vector<256x128xf32>
    %47 = tpu.matmul %44, %46, %cst_48 {dimension_numbers = #tpu.dot_dimension_numbers<[1], [0], [0], [1], [0, 0, 1, 1], [], []>} : vector<256x4xbf16>, vector<4x128xbf16>, vector<256x128xf32> -> vector<256x128xf32>
    %48 = arith.addf %42, %47 : vector<256x128xf32>
    %49 = vector.extract_strided_slice %1 {offsets = [2, 2, 0], sizes = [16, 16, 4], strides = [1, 1, 1]} : vector<18x18x4xbf16> to vector<16x16x4xbf16>
    %50 = vector.shape_cast %49 : vector<16x16x4xbf16> to vector<256x4xbf16>
    %c0_49 = arith.constant 0 : index
    %c2_50 = arith.constant 2 : index
    %c2_51 = arith.constant 2 : index
    %c0_52 = arith.constant 0 : index
    %c0_53 = arith.constant 0 : index
    %51 = vector.load %arg3[%c0_49, %c2_50, %c2_51, %c0_52, %c0_53] : memref<1x3x3x4x128xbf16, #tpu.memory_space<vmem>>, vector<1x1x1x4x128xbf16>
    %52 = vector.shape_cast %51 : vector<1x1x1x4x128xbf16> to vector<4x128xbf16>
    %cst_54 = arith.constant dense<0.000000e+00> : vector<256x128xf32>
    %53 = tpu.matmul %50, %52, %cst_54 {dimension_numbers = #tpu.dot_dimension_numbers<[1], [0], [0], [1], [0, 0, 1, 1], [], []>} : vector<256x4xbf16>, vector<4x128xbf16>, vector<256x128xf32> -> vector<256x128xf32>
    %54 = arith.addf %48, %53 : vector<256x128xf32>
    %c0_55 = arith.constant 0 : index
    %c0_56 = arith.constant 0 : index
    %c0_57 = arith.constant 0 : index
    %55 = vector.load %arg4[%c0_55, %c0_56, %c0_57] : memref<1x1x128xf32, #tpu.memory_space<vmem>>, vector<1x1x128xf32>
    %56 = vector.shape_cast %55 : vector<1x1x128xf32> to vector<1x128xf32>
    %57 = vector.broadcast %56 : vector<1x128xf32> to vector<256x128xf32>
    %58 = arith.mulf %54, %57 : vector<256x128xf32>
    %c0_58 = arith.constant 0 : index
    %c0_59 = arith.constant 0 : index
    %c0_60 = arith.constant 0 : index
    %59 = vector.load %arg5[%c0_58, %c0_59, %c0_60] : memref<1x1x128xf32, #tpu.memory_space<vmem>>, vector<1x1x128xf32>
    %60 = vector.shape_cast %59 : vector<1x1x128xf32> to vector<1x128xf32>
    %61 = vector.broadcast %60 : vector<1x128xf32> to vector<256x128xf32>
    %62 = arith.addf %58, %61 : vector<256x128xf32>
    %63 = arith.negf %62 : vector<256x128xf32>
    %64 = math.exp %63 : vector<256x128xf32>
    %cst_61 = arith.constant 1.000000e+00 : f32
    %65 = vector.broadcast %cst_61 : f32 to vector<256x128xf32>
    %66 = arith.addf %65, %64 : vector<256x128xf32>
    %67 = arith.divf %65, %66 : vector<256x128xf32>
    %68 = arith.mulf %62, %67 : vector<256x128xf32>
    %c0_62 = arith.constant 0 : index
    %c0_63 = arith.constant 0 : index
    %c0_64 = arith.constant 0 : index
    %c0_65 = arith.constant 0 : index
    %69 = vector.load %arg6[%c0_62, %c0_63, %c0_64, %c0_65] : memref<1x1x256x128xf32, #tpu.memory_space<vmem>>, vector<1x1x256x128xf32>
    %70 = vector.shape_cast %69 : vector<1x1x256x128xf32> to vector<256x128xf32>
    %71 = vector.shape_cast %68 : vector<256x128xf32> to vector<1x1x256x128xf32>
    tpu.vector_store %arg6[%c0_62, %c0_63, %c0_64, %c0_65], %71 {strides = array<i32>} : memref<1x1x256x128xf32, #tpu.memory_space<vmem>>, vector<1x1x256x128xf32>,
    return
  }
  func.func @transform_0(%arg0: i32, %arg1: i32) -> (i32, i32, i32, i32, i32) {
    %c0_i32 = arith.constant 0 : i32
    %c0_i32_0 = arith.constant 0 : i32
    %c0_i32_1 = arith.constant 0 : i32
    %c0_i32_2 = arith.constant 0 : i32
    return %arg0, %arg1, %c0_i32, %c0_i32_0, %c0_i32_1 : i32, i32, i32, i32, i32
  }
  func.func @transform_1(%arg0: i32, %arg1: i32) -> (i32, i32, i32, i32, i32) {
    %c0_i32 = arith.constant 0 : i32
    %c0_i32_0 = arith.constant 0 : i32
    %c0_i32_1 = arith.constant 0 : i32
    %c0_i32_2 = arith.constant 0 : i32
    %c0_i32_3 = arith.constant 0 : i32
    return %arg0, %c0_i32, %c0_i32_0, %c0_i32_1, %c0_i32_2 : i32, i32, i32, i32, i32
  }
  func.func @transform_2(%arg0: i32, %arg1: i32) -> (i32, i32, i32) {
    %c0_i32 = arith.constant 0 : i32
    %c0_i32_0 = arith.constant 0 : i32
    %c0_i32_1 = arith.constant 0 : i32
    return %arg0, %c0_i32, %c0_i32_0 : i32, i32, i32
  }
  func.func @transform_3(%arg0: i32, %arg1: i32) -> (i32, i32, i32) {
    %c0_i32 = arith.constant 0 : i32
    %c0_i32_0 = arith.constant 0 : i32
    %c0_i32_1 = arith.constant 0 : i32
    return %arg0, %c0_i32, %c0_i32_0 : i32, i32, i32
  }
  func.func @transform_4(%arg0: i32, %arg1: i32) -> (i32, i32, i32, i32) {
    %c0_i32 = arith.constant 0 : i32
    %c0_i32_0 = arith.constant 0 : i32
    %c0_i32_1 = arith.constant 0 : i32
    return %arg0, %arg1, %c0_i32, %c0_i32_0 : i32, i32, i32, i32
  }
}

</mosaic_0001>

<bundles_post_ra>
// kernel: _lambda_.1
= control target key start
LH: loop header
LB: loop body
LE: loop exit
PB: predicated region body
PF: predicated region fallthrough
CT: control target
= control target key end

     0   :  { %9 = vsyncpa [#allocation3], 0  ;;  %s6412_s0 = inlined_call_operand.hbm [shape: bf16[1,2,18,18,4], index: 0, kind: input, shape index: {}]   ;;  %s6413_s1 = inlined_call_operand.hbm [shape: bf16[1,3,3,4,128], index: 1, kind: input, shape index: {}]   ;;  %s6414_s2 = inlined_call_operand.hbm [shape: f32[1,1,128], index: 2, kind: input, shape index: {}]   ;;  %s6415_s3 = inlined_call_operand.hbm [shape: f32[1,1,128], index: 3, kind: input, shape index: {}]   ;;  %s6416_s4 = inlined_call_operand.hbm [shape: f32[1,2,256,128], index: 4, kind: output, shape index: {}]  }
   0x1   :  { %11 = vsyncpa [#allocation3 + $0x1], 0 }
   0x2   :  { %12 = vsyncpa [#allocation6], 0 }
   0x3   :  { %13 = vsyncpa [#allocation9], 0 }
   0x4   :  { %14 = vsyncpa [#allocation4], 0 }
   0x5   :  { %16 = vsyncpa [#allocation4 + $0x1], 0  ;;  %s4974_s15 = smov 0   ;;  %s4976_s16 = smov 0  }
   0x6   :  { %s4978_s17 = smov 0   ;;  %s4980_s18 = smov 0  }
   0x7   :  { %s4982_s19 = smov 0   ;;  %s4984_s20 = smov 0  }
   0x8 LB: > { %s3484_s21 = sadd.s32 4294967295, %s4936_s20   ;;  %s3485_s22 = sadd.s32 4294967294, %s4936_s20   ;;  %s4936_s20 = sphi %s4984_s20, %s22_s20   ;;  %s4932_s19 = sphi %s4982_s19, %s6517_s19   ;;  %s4928_s18 = sphi %s4980_s18, %s6516_s18   ;;  %s4924_s17 = sphi %s4978_s17, %s6515_s17   ;;  %s4920_s16 = sphi %s4976_s16, %s6514_s16   ;;  %s4916_s15 = sphi %s4974_s15, %s6513_s15  }
   0x9   : > { %p56_p0 = scmp.ne.s32.totalorder %s4920_s16, %s4916_s15  ;;  %p5008_p1 = scmp.eq.s32.totalorder %s3484_s21, 0 }
   0xa   : > { %p5012_p2 = scmp.eq.s32.totalorder %s3484_s21, 1  ;;  %p166_p3 = scmp.eq.s32.totalorder %s3485_s22, 1 }
   0xb   : > { %s6452_s23 = scalar_select %p5008_p1, 1, 0 }
   0xc   : > { %s6453_s24 = scalar_select %p5012_p2, 1, 0 }
   0xd   : > { %p5018_p4 = por %p5008_p1, %p56_p0  ;;  %p3486_p5 = scmp.ge.s32.totalorder %s4936_s20, 1 }
   0xe   : > { %p5023_p6 = por %p166_p3, %p56_p0  ;;  %p173_p7 = scmp.lt.s32.totalorder %s4936_s20, 3 }
   0xf   : > { %s6454_s25 = scalar_select %p5018_p4, 1, 0 }
  0x10   : > { %s6455_s26 = scalar_select %p5023_p6, 1, 0 }
  0x11   : > { %p5028_p8 = pnand %p3486_p5, %p173_p7  ;;  %s4938_s28 = smov [#allocation5]  }
  0x12   : > { %6456 = sst [smem:[#allocation15_spill]] %s6455_s26  ;;  %s188_s29 = sshll.u32 %s4938_s28, 4  ;;  %s5032_s29 = int_to_ptr.vmem [resolvable:$true] %s188_s29 }
  0x13   : > { %s6457_s27 = scalar_select %p5028_p8, 1, 0 }
  0x14   : > { %p4499_p9 = pneg %p5028_p8  ;;  %s4939_s5 = smov [#allocation7]  }
  0x15   : > { %s204_s6 = sshll.u32 %s4939_s5, 4  ;;  %s4940_s7 = smov [#allocation8]   ;;  %s5043_s6 = int_to_ptr.vmem [resolvable:$true] %s204_s6 }
  0x16   : > { %p5039_p11 = pnand %p4499_p9, %p5008_p1  ;;  %s5045_s8 = sshll.u32 %s4940_s7, 4  ;;  %s218_s8 = int_to_ptr.vmem [resolvable:$true] %s5045_s8 }
  0x17   : > { %s4732_s11 = scalar_lea.hbm %s6413_s1, 288 }
  0x18   : > { %p4733_p12 = scmp.ne.s32.totalorder %s6413_s1, %s4732_s11  ;;  %p5055_p13 = pneg %p5039_p11 }
  0x19   : > { %p4739_p5 = scmp.lt.u32.totalorder %s4732_s11, %s6413_s1 }
  0x1a   : > { %p4735_p0 = pnand %p5055_p13, %p4733_p12 }
  0x1c   : > { %p4736_p3 = pneg %p4735_p0 }
  0x1e   : > { %p4741_p7 = pnand %p4739_p5, %p4736_p3 }
  0x20   : > { %4744 = shalt.err (!%p4741_p7)
}
  0x21   : > { %s4745_s28 = scalar_lea.vmem %s5032_s29, 288  ;;  %p4753_p1 = scmp.lt.s32.totalorder %s5032_s29, %s5032_s29 }
  0x22   : > { %p4746_p9 = scmp.ne.s32.totalorder %s5032_s29, %s4745_s28  ;;  %p4754_p4 = scmp.lt.s32.totalorder %s4745_s28, %s4745_s28 }
  0x24   : > { %p4748_p10 = pnand %p4746_p9, %p5055_p13  ;;  %p4755_p12 = por %p4754_p4, %p4753_p1 }
  0x26   : > { %p4749_p6 = pneg %p4748_p10 }
  0x28   : > { %p4756_p0 = pnand %p4755_p12, %p4749_p6 }
  0x2a   : > { %4759 = shalt.err (!%p4756_p0)
}
  0x2b   : > { %s4941_s5 = smov 32   ;;  %s4942_s7 = smov 2  }
  0x2c   : > { %4502 = dma.hbm_to_vmem [thread:$0]  (!%p5039_p11), %s6413_s1, 288, %s5032_s29, [#allocation6], %s4941_s5, %s4941_s5, %s4942_s7  }
  0x2d   : > { %s4760_s13 = scalar_lea.hbm %s6414_s2, 16 }
  0x2e   : > { %p4761_p1 = scmp.ne.s32.totalorder %s6414_s2, %s4760_s13  ;;  %p4767_p10 = scmp.lt.u32.totalorder %s4760_s13, %s6414_s2 }
  0x30   : > { %p4763_p4 = pnand %p4761_p1, %p5055_p13 }
  0x32   : > { %p4764_p6 = pneg %p4763_p4 }
  0x34   : > { %p4769_p3 = pnand %p4767_p10, %p4764_p6 }
  0x36   : > { %4772 = shalt.err (!%p4769_p3)
}
  0x37   : > { %s4773_s29 = scalar_lea.vmem %s5043_s6, 16  ;;  %s4780_s5 = scalar_lea.vmem %s5043_s6, 32 }
  0x38   : > { %p4774_p5 = scmp.ne.s32.totalorder %s5043_s6, %s4773_s29  ;;  %p4781_p12 = scmp.lt.s32.totalorder %s5043_s6, %s5043_s6 }
  0x39   : > { %p4782_p0 = scmp.lt.s32.totalorder %s4780_s5, %s4773_s29 }
  0x3a   : > { %p4776_p7 = pnand %p4774_p5, %p5055_p13 }
  0x3b   : > { %p4783_p1 = por %p4782_p0, %p4781_p12 }
  0x3c   : > { %p4777_p9 = pneg %p4776_p7 }
  0x3e   : > { %p4784_p4 = pnand %p4783_p1, %p4777_p9 }
  0x40   : > { %4787 = shalt.err (!%p4784_p4)
}
  0x41   : > { %4505 = dma.hbm_to_vmem [thread:$0]  (!%p5039_p11), %s6414_s2, 16, %s5043_s6, [#allocation6]  }
  0x42   : > { %s4788_s11 = scalar_lea.hbm %s6415_s3, 16 }
  0x43   : > { %p4789_p6 = scmp.ne.s32.totalorder %s6415_s3, %s4788_s11  ;;  %p4795_p5 = scmp.lt.u32.totalorder %s4788_s11, %s6415_s3 }
  0x45   : > { %p4791_p10 = pnand %p4789_p6, %p5055_p13 }
  0x47   : > { %p4792_p3 = pneg %p4791_p10 }
  0x49   : > { %p4797_p7 = pnand %p4795_p5, %p4792_p3 }
  0x4b   : > { %4800 = shalt.err (!%p4797_p7)
}
  0x4c   : > { %s4801_s28 = scalar_lea.vmem %s218_s8, 16  ;;  %s4808_s6 = scalar_lea.vmem %s218_s8, 32 }
  0x4d   : > { %p4802_p9 = scmp.ne.s32.totalorder %s218_s8, %s4801_s28  ;;  %p4809_p1 = scmp.lt.s32.totalorder %s218_s8, %s218_s8 }
  0x4e   : > { %p4810_p4 = scmp.lt.s32.totalorder %s4808_s6, %s4801_s28 }
  0x4f   : > { %p4804_p12 = pnand %p4802_p9, %p5055_p13 }
  0x50   : > { %p4811_p8 = por %p4810_p4, %p4809_p1 }
  0x51   : > { %p4805_p0 = pneg %p4804_p12 }
  0x53   : > { %p4812_p2 = pnand %p4811_p8, %p4805_p0 }
  0x55   : > { %4815 = shalt.err (!%p4812_p2)
}
  0x56   : > { %4508 = dma.hbm_to_vmem [thread:$0]  (!%p5039_p11), %s6415_s3, 16, %s218_s8, [#allocation9]  }
  0x57   : > { %s43_s14 = sadd.s32 1, %s4924_s17  ;;  %s31_s26 = sadd.s32 1, %s4932_s19 }
  0x58   : > { %p50_p2 = scmp.ne.s32.totalorder %s4924_s17, %s4920_s16  ;;  %p32_p8 = scmp.ge.s32.totalorder %s31_s26, 2 }
  0x59   : > { %p51_p13 = scmp.eq.s32.totalorder %s4936_s20, 0  ;;  %p6460_p6 = scmp.ne.s32.totalorder %s6453_s24, 0 }
  0x5a   : > { %p4520_p3 = scmp.lt.s32.totalorder %s4936_s20, 2  ;;  %s6519_s26 = smov (%p32_p8, %s31_s26), 0 }
  0x5b   : > { %p5126_p10 = por %p6460_p6, %p50_p2  ;;  %p52_p5 = por %p51_p13, %p50_p2 }
  0x5c   : > { %s228_s7 = sand.u32 1, %s4924_s17   ;;  %s39_s9 = ssub.s32 %s4932_s19, %s6519_s26 }
  0x5d   : > { %p41_p7 = scmp.eq.s32.totalorder %s39_s9, 0  ;;  %s4480_s8 = smul.u32 216, %s228_s7 }
  0x5e   : > { %s4481_s10 = smul.u32 3456, %s4932_s19  ;;  %p5137_p11 = pnand %p4520_p3, %p52_p5 }
  0x5f   : > { %s5142_s24 = scalar_select %p41_p7, %s4924_s17, %s43_s14  }
  0x60   : > { %s5147_s21 = scalar_lea.hbm %s6412_s0, %s4481_s10  ;;  %s232_s22 = scalar_lea.vmem [#allocation2], %s4480_s8 }
  0x61   : > { %s241_s28 = sshll.u32 %s232_s22, 4  ;;  %s5151_s6 = scalar_lea.sflag [#allocation3], %s228_s7  ;;  %s5149_s28 = int_to_ptr.vmem [resolvable:$true] %s241_s28 }
  0x62   : > { %s4816_s29 = scalar_lea.hbm %s5147_s21, 3456  ;;  %p4818_p12 = pneg %p5137_p11 }
  0x63   : > { %p4817_p9 = scmp.ne.s32.totalorder %s5147_s21, %s4816_s29  ;;  %s4821_s9 = scalar_lea.hbm %s6412_s0, 6912 }
  0x64   : > { %p4822_p4 = scmp.lt.u32.totalorder %s5147_s21, %s6412_s0  ;;  %p4823_p2 = scmp.lt.u32.totalorder %s4821_s9, %s4816_s29 }
  0x65   : > { %p4819_p0 = pnand %p4818_p12, %p4817_p9  ;;  %p4825_p13 = scmp.lt.u32.totalorder %s4816_s29, %s5147_s21 }
  0x66   : > { %p4824_p8 = por %p4823_p2, %p4822_p4 }
  0x67   : > { %p4820_p1 = pneg %p4819_p0 }
  0x68   : > { %p4826_p6 = por %p4825_p13, %p4824_p8 }
  0x6a   : > { %p4827_p3 = pnand %p4826_p6, %p4820_p1 }
  0x6c   : > { %4830 = shalt.err (!%p4827_p3)
}
  0x6d   : > { %s4831_s7 = scalar_lea.vmem %s5149_s28, 3456  ;;  %s4943_s8 = smov [#allocation2]  }
  0x6e   : > { %p4832_p5 = scmp.ne.s32.totalorder %s5149_s28, %s4831_s7  ;;  %s4836_s13 = sshll.u32 %s4943_s8, 4  ;;  %s4837_s13 = int_to_ptr.vmem [resolvable:$false] %s4836_s13 }
  0x6f   : > { %s4838_s22 = scalar_lea.vmem %s4837_s13, 6912  ;;  %p4839_p0 = scmp.lt.s32.totalorder %s5149_s28, %s4837_s13 }
  0x70   : > { %p4834_p7 = pnand %p4832_p5, %p4818_p12  ;;  %p4840_p4 = scmp.lt.s32.totalorder %s4838_s22, %s4831_s7 }
  0x72   : > { %p4835_p9 = pneg %p4834_p7  ;;  %p4841_p2 = por %p4840_p4, %p4839_p0 }
  0x74   : > { %p4842_p8 = pnand %p4841_p2, %p4835_p9 }
  0x76   : > { %4845 = shalt.err (!%p4842_p8)
}
  0x77   : > { %s4944_s29 = smov 64   ;;  %s4945_s5 = smov 4  }
  0x78   : > { %4512 = dma.hbm_to_vmem [thread:$0]  (!%p5137_p11), %s5147_s21, 3456, %s5149_s28, %s5151_s6, %s4944_s29, %s4944_s29, %s4945_s5  }
  0x79   : > { %p6463_p12 = scmp.ne.s32.totalorder %s6457_s27, 0 }
  0x7b   : > { %253 = sbr.rel (%p6463_p12) target bundleno = 724 (0x2d4), region = 36 }
  0x82   : > { %s5182_s14 = sand.u32 1, %s4920_s16   ;;  %p6464_p1 = scmp.ne.s32.totalorder %s6454_s25, 0 }
  0x83   : > { %s4482_s9 = smul.u32 216, %s5182_s14  ;;  %s256_s10 = scalar_lea.sflag [#allocation3], %s5182_s14 }
  0x85   : > { %s5186_s12 = scalar_lea.vmem [#allocation2], %s4482_s9 }
  0x86   : > { %4899 = dma.done.wait (%p6464_p1), %s256_s10, 3456  }
  0x87   : > { %4901 = vsyncadd (%p6464_p1), %s256_s10, 4294963840  ;;  %p6465_p11 = scmp.ne.s32.totalorder %s6452_s23, 0 }
  0x89   : > { %4903 = dma.done.wait (%p6465_p11), [#allocation6], 304  }
  0x8a   : > { %4905 = vsyncadd (%p6465_p11), [#allocation6], 4294966992 }
  0x8b   : > { %4907 = dma.done.wait (%p6465_p11), [#allocation9], 16  }
  0x8c   : > { %4909 = vsyncadd (%p6465_p11), [#allocation9], 4294967280  ;;  %vm838_vm0 = vcmask 1041408   ;;  %vm352_vm1 = vsmask.f32 3328  ;;  %vm789_vm3 = vcmask 31744  }
  0x8d   : > { %vm353_vm2 = vsmask.f32 7440  ;;  %v740_v0 = vld [vmem:[#allocation5 + $0x2] sm:$0x3]  ;;  %v1951_v1 = vld [vmem:[#allocation5 + $0x8] sm:$0x3] }
  0x8e   : > { %v5201_v2 = vld [vmem:[%s5186_s12] sm:$0xf]  ;;  %4470 = vmatprep.subr.msk.bf16.mxu1 %vm838_vm0, %v740_v0  ;;  %4474 = vmatprep.subr.msk.bf16.mxu0 %vm838_vm0, %v1951_v1  ;;  %v840_v3 = vsel %vm838_vm0, %v740_v0, 0  ;;  %v5207_v4 = vsel %vm838_vm0, %v1951_v1, 0  ;;  %v5210_v5 = vld [vmem:[%s5186_s12 + $0x4] sm:$0xf]  ;;  %vm5239_vm4 = vmor %vm352_vm1, %vm353_vm2 }
  0x8f   : > { %6466 = vst [vmem:[#allocation16_spill] sm:$0xff] %v5207_v4  ;;  %v299_v6 = vld [vmem:[%s5186_s12 + $0x8] sm:$0x1]  ;;  %3907 = vmatpush3.bf16.msra.mxu1 %v840_v3  ;;  %4043 = vmatpush3.bf16.msra.mxu0 %v5207_v4  ;;  %v356_v7 = vshrl.u32 %v5201_v2, 16  ;;  %v359_v8 = vshll.u32 %v5201_v2, 16  ;;  %v365_v9 = vshll.u32 %v5210_v5, 16 }
  0x90   : > { %v369_v10 = vshrl.u32 %v5210_v5, 16  ;;  %v351_v11 = vld [vmem:[#allocation5] sm:$0x3]  ;;  %v375_v12 = vshll.u32 %v299_v6, 16  ;;  %v5220_v13 = vld [vmem:[%s5186_s12 + $0xc] sm:$0xf] }
  0x91   : > { %4471 = vmatprep.subr.msk.bf16.mxu1 %vm838_vm0, %v351_v11  ;;  %v5223_v14 = vld [vmem:[%s5186_s12 + $0x10] sm:$0xf]  ;;  %v358_v15 = vrot.slane %v356_v7, 4  ;;  %v361_v16 = vrot.slane %v359_v8, 5  ;;  %v367_v17 = vrot.slane %v365_v9, 5  ;;  %v380_v21 = vshrl.u32 %v5220_v13, 16 }
  0x92   : > { %v371_v18 = vrot.slane %v369_v10, 4  ;;  %v5226_v19 = vld [vmem:[%s5186_s12 + $0x14] sm:$0x1]  ;;  %v377_v20 = vrot.slane %v375_v12, 5  ;;  %v383_v22 = vshll.u32 %v5220_v13, 16  ;;  %v389_v23 = vshll.u32 %v5223_v14, 16 }
  0x93   : > { %v2163_v24 = vld [vmem:[#allocation5 + $0xa] sm:$0x3]  ;;  %v362_v25 = vor.u32 %v361_v16, %v358_v15  ;;  %v393_v27 = vshrl.u32 %v5223_v14, 16  ;;  %v399_v28 = vshll.u32 %v5226_v19, 16  ;;  %v382_v31 = vrot.slane %v380_v21, 4  ;;  %s3496_s23 = sshll.u32 %s5182_s14, 8 }
  0x94   : > { %v372_v26 = vor.u32 %v371_v18, %v367_v17  ;;  %4476 = vmatprep.subr.msk.bf16.mxu0 %vm838_vm0, %v2163_v24  ;;  %v5235_v29 = vld [vmem:[%s5186_s12 + $0x18] sm:$0xf]  ;;  %v385_v32 = vrot.slane %v383_v22, 5  ;;  %v391_v33 = vrot.slane %v389_v23, 5  ;;  %v5245_v34 = vcombine.low %v5220_v13, %v5223_v14  ;;  %v5248_v39 = vld [vmem:[%s5186_s12 + $0x1c] sm:$0xf] }
  0x95   : > { %v363_v35 = vrot.slane %v362_v25, 4  ;;  %v395_v37 = vrot.slane %v393_v27, 4  ;;  %v401_v38 = vrot.slane %v399_v28, 5  ;;  %v1326_v41 = vrot.slane %v5226_v19, 5  ;;  %v5253_v43 = vld [vmem:[%s5186_s12 + $0x20] sm:$0x1] }
  0x96   : > { %v373_v36 = vrot.slane %v372_v26, 4  ;;  %v386_v40 = vor.u32 %v385_v32, %v382_v31  ;;  %v1132_v42 = vsel %vm838_vm0, %v351_v11, 0  ;;  %v404_v44 = vshrl.u32 %v5235_v29, 16  ;;  %v5265_v57 = vld [vmem:[%s5186_s12 + $0x24] sm:$0xf]  ;;  %s6212_s25 = scalar_lea.vmem [#allocation10], %s3496_s23 }
  0x97   : > { %v368_v45 = vsel %vm5239_vm4, %v363_v35, %v367_v17  ;;  %v396_v47 = vor.u32 %v395_v37, %v391_v33  ;;  %v407_v48 = vshll.u32 %v5235_v29, 16  ;;  %v413_v52 = vshll.u32 %v5248_v39, 16  ;;  %v5273_v62 = vld [vmem:[%s5186_s12 + $0x28] sm:$0xf]  ;;  %v5278_v6 = vld [vmem:[%s5186_s12 + $0x2c] sm:$0x1] }
  0x98   : > { %v378_v46 = vsel %vm5239_vm4, %v373_v36, %v377_v20  ;;  %v387_v50 = vrot.slane %v386_v40, 4  ;;  %v406_v51 = vrot.slane %v404_v44, 4  ;;  %v417_v55 = vshrl.u32 %v5248_v39, 16  ;;  %v5281_v7 = vld [vmem:[%s5186_s12 + $0x30] sm:$0xf]  ;;  %s3752_s27 = sshll.u32 %s4928_s18, 12 }
  0x99   : > { %v3497_v49 = vcombine.low %v368_v45, %v378_v46  ;;  %v397_v53 = vrot.slane %v396_v47, 4  ;;  %v409_v54 = vrot.slane %v407_v48, 5  ;;  %v423_v56 = vshll.u32 %v5253_v43, 16  ;;  %v5292_v22 = vld [vmem:[%s5186_s12 + $0x34] sm:$0xf]  ;;  %s3362_s11 = sshll.u32 %s6212_s25, 4  ;;  %s6357_s6 = scalar_lea.hbm %s6416_s4, %s3752_s27  ;;  %s6359_s11 = int_to_ptr.vmem [resolvable:$true] %s3362_s11 }
  0x9a   : > { %v392_v58 = vsel %vm5239_vm4, %v387_v50, %v391_v33  ;;  %v415_v59 = vrot.slane %v413_v52, 5  ;;  %v1330_v60 = vrot.slane %v5248_v39, 5  ;;  %v1333_v61 = vrot.slane %v5253_v43, 5  ;;  %v5298_v28 = vld [vmem:[%s5186_s12 + $0x38] sm:$0x1]  ;;  %s3347_s18 = scalar_lea.sflag [#allocation4], %s5182_s14 }
  0x9b   : > { %3908 = vmatprep.mubr.msk.bf16.mxu1 %vm789_vm3, %v3497_v49  ;;  %v402_v63 = vsel %vm5239_vm4, %v397_v53, %v401_v38  ;;  %v410_v0 = vor.u32 %v409_v54, %v406_v51  ;;  %v419_v1 = vrot.slane %v417_v55, 4  ;;  %v425_v3 = vrot.slane %v423_v56, 5  ;;  %v5302_v36 = vld [vmem:[%s5186_s12 + $0x3c] sm:$0xf]  ;;  %v5312_v48 = vld [vmem:[%s5186_s12 + $0x40] sm:$0xf] }
  0x9c   : > { %v3498_v8 = vcombine.low %v392_v58, %v402_v63  ;;  %v2171_v9 = vsel %vm838_vm0, %v2163_v24, 0  ;;  %v428_v10 = vshrl.u32 %v5265_v57, 16  ;;  %v431_v11 = vshll.u32 %v5265_v57, 16  ;;  %v5315_v52 = vld [vmem:[%s5186_s12 + $0x44] sm:$0x1]  ;;  %s4846_s7 = scalar_lea.vmem %s6359_s11, 4096 }
  0x9d   : > { %v411_v12 = vrot.slane %v410_v0, 4  ;;  %v420_v15 = vor.u32 %v419_v1, %v415_v59  ;;  %v437_v16 = vshll.u32 %v5273_v62, 16  ;;  %v441_v17 = vshrl.u32 %v5273_v62, 16  ;;  %v5328_v63 = vld [vmem:[#allocation5 + $0xc] sm:$0x3]  ;;  %p4847_p13 = scmp.ne.s32.totalorder %s6359_s11, %s4846_s7  ;;  %s4946_s8 = smov [#allocation10]  }
  0x9e   : > { %4044 = vmatprep.mubr.msk.bf16.mxu0 %vm789_vm3, %v3498_v8  ;;  %3909 = vmatmul.mubr.msk.bf16.vlgmr.msra.gmra.mrb[0].mxu1 %vm789_vm3, %v3498_v8  ;;  %v430_v18 = vrot.slane %v428_v10, 4  ;;  %v433_v20 = vrot.slane %v431_v11, 5  ;;  %v447_v21 = vshll.u32 %v5278_v6, 16  ;;  %v452_v23 = vshrl.u32 %v5281_v7, 16  ;;  %s4850_s13 = sshll.u32 %s4946_s8, 4  ;;  %s4851_s13 = int_to_ptr.vmem [resolvable:$false] %s4850_s13 }
  0x9f   : > { %3941 = vmatpush3.bf16.msra.mxu1 %v1132_v42  ;;  %v416_v24 = vsel %vm5239_vm4, %v411_v12, %v415_v59  ;;  %v421_v25 = vrot.slane %v420_v15, 4  ;;  %v439_v26 = vrot.slane %v437_v16, 5  ;;  %v443_v27 = vrot.slane %v441_v17, 4  ;;  %v5326_v59 = vld [vmem:[%s5186_s12 + $0x48] sm:$0xf]  ;;  %p4848_p6 = pnand %p4847_p13, %p5126_p10  ;;  %s4852_s22 = scalar_lea.vmem %s4851_s13, 8192 }
  0xa0   : > { %v434_v31 = vor.u32 %v433_v20, %v430_v18  ;;  %v449_v32 = vrot.slane %v447_v21, 5  ;;  %v454_v33 = vrot.slane %v452_v23, 4  ;;  %v455_v35 = vshll.u32 %v5281_v7, 16  ;;  %v5337_v16 = vld [vmem:[%s5186_s12 + $0x4c] sm:$0xf]  ;;  %p4853_p5 = scmp.lt.s32.totalorder %s6359_s11, %s4851_s13  ;;  %p4854_p7 = scmp.lt.s32.totalorder %s4852_s22, %s4846_s7 }
  0xa1   : > { %v426_v37 = vsel %vm5239_vm4, %v421_v25, %v425_v3  ;;  %v444_v38 = vor.u32 %v443_v27, %v439_v26  ;;  %v461_v40 = vshll.u32 %v5292_v22, 16  ;;  %v465_v42 = vshrl.u32 %v5292_v22, 16  ;;  %v5350_v25 = vld [vmem:[%s5186_s12 + $0x50] sm:$0x1]  ;;  %v5354_v27 = vld [vmem:[%s5186_s12 + $0x54] sm:$0xf]  ;;  %p4849_p3 = pneg %p4848_p6 }
  0xa2   : > { %v5308_v44 = vcombine.low %v416_v24, %v426_v37  ;;  %v435_v45 = vrot.slane %v434_v31, 4  ;;  %v457_v46 = vrot.slane %v455_v35, 5  ;;  %v471_v47 = vshll.u32 %v5298_v28, 16  ;;  %p4855_p9 = por %p4854_p7, %p4853_p5 }
  0xa3   : > { %v445_v49 = vrot.slane %v444_v38, 4  ;;  %v463_v50 = vrot.slane %v461_v40, 5  ;;  %v467_v51 = vrot.slane %v465_v42, 4  ;;  %v476_v53 = vshrl.u32 %v5302_v36, 16 }
  0xa4   : > { %6469 = vst [vmem:[#allocation17_spill] sm:$0xff] %v5308_v44  ;;  %4045 = vmatmul.mubr.msk.bf16.vlgmr.msra.gmra.mrb[0].mxu0 %vm789_vm3, %v5308_v44  ;;  %3912 = vmatprep.mubr.msk.bf16.mxu1 %vm789_vm3, %v5308_v44  ;;  %v440_v54 = vsel %vm5239_vm4, %v435_v45, %v439_v26  ;;  %v458_v55 = vor.u32 %v457_v46, %v454_v33  ;;  %v473_v56 = vrot.slane %v471_v47, 5  ;;  %v479_v58 = vshll.u32 %v5302_v36, 16  ;;  %v5362_v45 = vld [vmem:[%s5186_s12 + $0x58] sm:$0xf]  ;;  %p4856_p0 = pnand %p4855_p9, %p4849_p3 }
  0xa5   : > { %4077 = vmatpush3.bf16.msra.mxu0 %v2171_v9  ;;  %v450_v0 = vsel %vm5239_vm4, %v445_v49, %v449_v32  ;;  %v468_v1 = vor.u32 %v467_v51, %v463_v50  ;;  %v478_v3 = vrot.slane %v476_v53, 4  ;;  %v485_v8 = vshll.u32 %v5312_v48, 16 }
  0xa6   : > { %v5333_v10 = vcombine.low %v440_v54, %v450_v0  ;;  %v459_v11 = vrot.slane %v458_v55, 4  ;;  %v481_v12 = vrot.slane %v479_v58, 5  ;;  %v489_v15 = vshrl.u32 %v5312_v48, 16  ;;  %4477 = vmatprep.subr.msk.bf16.mxu0 %vm838_vm0, %v5328_v63  ;;  %v5374_v55 = vld [vmem:[%s5186_s12 + $0x5c] sm:$0x1] }
  0xa7   : > { %v469_v9 = vrot.slane %v468_v1, 4  ;;  %v487_v17 = vrot.slane %v485_v8, 5  ;;  %v495_v18 = vshll.u32 %v5315_v52, 16  ;;  %v500_v20 = vshrl.u32 %v5326_v59, 16  ;;  %v5379_v8 = vld [vmem:[%s5186_s12 + $0x60] sm:$0xf] }
  0xa8   : > { %6470 = vst [vmem:[#allocation18_spill] sm:$0xff] %v5333_v10  ;;  %4048 = vmatprep.mubr.msk.bf16.mxu0 %vm789_vm3, %v5333_v10  ;;  %3913 = vmatmul.mubr.msk.bf16.gmra.mrb[4].mxu1 %vm789_vm3, %v5333_v10  ;;  %v464_v21 = vsel %vm5239_vm4, %v459_v11, %v463_v50  ;;  %v482_v23 = vor.u32 %v481_v12, %v478_v3  ;;  %v491_v24 = vrot.slane %v489_v15, 4  ;;  %v503_v26 = vshll.u32 %v5326_v59, 16 }
  0xa9   : > { %v474_v31 = vsel %vm5239_vm4, %v469_v9, %v473_v56  ;;  %v497_v32 = vrot.slane %v495_v18, 5  ;;  %v502_v33 = vrot.slane %v500_v20, 4  ;;  %v509_v35 = vshll.u32 %v5337_v16, 16 }
  0xaa   : > { %vm1311_vm5 = vcmask 1042432   ;;  %vm1312_vm6 = vcmask 1046532   ;;  %v5359_v37 = vcombine.low %v464_v21, %v474_v31  ;;  %v483_v38 = vrot.slane %v482_v23, 4 }
  0xab   : > { %v492_v40 = vor.u32 %v491_v24, %v487_v17  ;;  %v505_v42 = vrot.slane %v503_v26, 5  ;;  %v511_v46 = vrot.slane %v509_v35, 5  ;;  %v513_v47 = vshrl.u32 %v5337_v16, 16  ;;  %vm5417_vm7 = vmor %vm1311_vm5, %vm1312_vm6 }
  0xac   : > { %6471 = vst [vmem:[#allocation19_spill] sm:$0xff] %v5359_v37  ;;  %v519_v49 = vshll.u32 %v5350_v25, 16  ;;  %v524_v50 = vshrl.u32 %v5354_v27, 16  ;;  %4049 = vmatmul.mubr.msk.bf16.gmra.mrb[4].mxu0 %vm789_vm3, %v5359_v37  ;;  %3916 = vmatprep.mubr.msk.bf16.mxu1 %vm789_vm3, %v5359_v37  ;;  %v488_v51 = vsel %vm5239_vm4, %v483_v38, %v487_v17  ;;  %v527_v56 = vshll.u32 %v5354_v27, 16  ;;  %v5385_v17 = vld [vmem:[%s5186_s12 + $0x64] sm:$0xf] }
  0xad   : > { %v493_v53 = vrot.slane %v492_v40, 4  ;;  %v506_v54 = vor.u32 %v505_v42, %v502_v33  ;;  %v515_v58 = vrot.slane %v513_v47, 4  ;;  %v533_v3 = vshll.u32 %v5362_v45, 16  ;;  %v5393_v33 = vld [vmem:[%s5186_s12 + $0x68] sm:$0x1] }
  0xae   : > { %v521_v0 = vrot.slane %v519_v49, 5  ;;  %v526_v1 = vrot.slane %v524_v50, 4  ;;  %v529_v15 = vrot.slane %v527_v56, 5  ;;  %v537_v9 = vshrl.u32 %v5362_v45, 16 }
  0xaf   : > { %v498_v11 = vsel %vm5239_vm4, %v493_v53, %v497_v32  ;;  %v507_v12 = vrot.slane %v506_v54, 4  ;;  %v516_v20 = vor.u32 %v515_v58, %v511_v46  ;;  %v535_v21 = vrot.slane %v533_v3, 5 }
  0xb0   : > { %v5387_v18 = vcombine.low %v488_v51, %v498_v11  ;;  %v543_v23 = vshll.u32 %v5374_v55, 16  ;;  %v530_v26 = vor.u32 %v529_v15, %v526_v1  ;;  %v539_v31 = vrot.slane %v537_v9, 4  ;;  %v5404_v51 = vld [vmem:[%s5186_s12 + $0x6c] sm:$0xf]  ;;  %v5409_v1 = vld [vmem:[#allocation5 + $0x4] sm:$0x3] }
  0xb1   : > { %v512_v24 = vsel %vm5239_vm4, %v507_v12, %v511_v46  ;;  %v548_v32 = vshrl.u32 %v5379_v8, 16  ;;  %v517_v35 = vrot.slane %v516_v20, 4  ;;  %v551_v40 = vshll.u32 %v5379_v8, 16  ;;  %4472 = vmatprep.subr.msk.bf16.mxu1 %vm838_vm0, %v5409_v1 }
  0xb2   : > { %6472 = vst [vmem:[#allocation20_spill] sm:$0xff] %v5387_v18  ;;  %4052 = vmatprep.mubr.msk.bf16.mxu0 %vm789_vm3, %v5387_v18  ;;  %3917 = vmatmul.mubr.msk.bf16.gmra.mrb[8].mxu1 %vm789_vm3, %v5387_v18  ;;  %v545_v38 = vrot.slane %v543_v23, 5  ;;  %v557_v42 = vshll.u32 %v5385_v17, 16  ;;  %v531_v47 = vrot.slane %v530_v26, 4  ;;  %v540_v46 = vor.u32 %v539_v31, %v535_v21  ;;  %v5426_v26 = vld [vmem:[%s5186_s12 + $0x70] sm:$0xf] }
  0xb3   : > { %v550_v49 = vrot.slane %v548_v32, 4  ;;  %v561_v50 = vshrl.u32 %v5385_v17, 16  ;;  %v522_v53 = vsel %vm5239_vm4, %v517_v35, %v521_v0  ;;  %v553_v54 = vrot.slane %v551_v40, 5  ;;  %v5435_v32 = vld [vmem:[%s5186_s12 + $0x74] sm:$0x1] }
  0xb4   : > { %v559_v56 = vrot.slane %v557_v42, 5  ;;  %v567_v58 = vshll.u32 %v5393_v33, 16  ;;  %v5411_v3 = vcombine.low %v512_v24, %v522_v53  ;;  %v536_v11 = vsel %vm5239_vm4, %v531_v47, %v535_v21 }
  0xb5   : > { %v541_v12 = vrot.slane %v540_v46, 4  ;;  %v563_v15 = vrot.slane %v561_v50, 4  ;;  %v554_v0 = vor.u32 %v553_v54, %v550_v49  ;;  %v3562_v23 = vrot.slane %v5220_v13, 9 }
  0xb6   : > { %6473 = vst [vmem:[#allocation21_spill] sm:$0xff] %v5411_v3  ;;  %v569_v20 = vrot.slane %v567_v58, 5  ;;  %v1323_v24 = vrot.slane %v5223_v14, 5  ;;  %4053 = vmatmul.mubr.msk.bf16.gmra.mrb[8].mxu0 %vm789_vm3, %v5411_v3  ;;  %3920 = vmatprep.mubr.msk.bf16.mxu1 %vm789_vm3, %v5411_v3  ;;  %v572_v35 = vshrl.u32 %v5404_v51, 16  ;;  %v575_v13 = vshll.u32 %v5404_v51, 16 }
  0xb7   : > { %v546_v21 = vsel %vm5239_vm4, %v541_v12, %v545_v38  ;;  %v564_v31 = vor.u32 %v563_v15, %v559_v56  ;;  %v555_v40 = vrot.slane %v554_v0, 4  ;;  %v581_v38 = vshll.u32 %v5426_v26, 16  ;;  %v5457_v12 = vld [vmem:[%s5186_s12 + $0x78] sm:$0xf] }
  0xb8   : > { %v5439_v14 = vcombine.low %v536_v11, %v546_v21  ;;  %v1324_v42 = vsel %vm5417_vm7, %v3562_v23, %v1323_v24  ;;  %v1325_v47 = vrot.slane %v1323_v24, 4  ;;  %v574_v49 = vrot.slane %v572_v35, 4 }
  0xb9   : > { %v565_v46 = vrot.slane %v564_v31, 4  ;;  %v577_v50 = vrot.slane %v575_v13, 5  ;;  %v560_v53 = vsel %vm5239_vm4, %v555_v40, %v559_v56  ;;  %v585_v58 = vshrl.u32 %v5426_v26, 16  ;;  %v5464_v56 = vld [vmem:[%s5186_s12 + $0x7c] sm:$0xf] }
  0xba   : > { %6476 = vst [vmem:[#allocation22_spill] sm:$0xff] %v5439_v14  ;;  %4056 = vmatprep.mubr.msk.bf16.mxu0 %vm789_vm3, %v5439_v14  ;;  %3921 = vmatmul.mubr.msk.bf16.gmra.mrb[12].mxu1 %vm789_vm3, %v5439_v14  ;;  %v1327_v54 = vsel %vm5417_vm7, %v1325_v47, %v1326_v41  ;;  %v591_v11 = vshll.u32 %v5435_v32, 16  ;;  %v583_v24 = vrot.slane %v581_v38, 5  ;;  %v3563_v31 = vrot.slane %v5235_v29, 9 }
  0xbb   : > { %v570_v15 = vsel %vm5239_vm4, %v565_v46, %v569_v20  ;;  %v5461_v0 = vcombine.low %v1324_v42, %v1327_v54  ;;  %v578_v23 = vor.u32 %v577_v50, %v574_v49  ;;  %v587_v21 = vrot.slane %v585_v58, 4  ;;  %v5481_v46 = vld [vmem:[%s5186_s12 + $0x80] sm:$0x1]  ;;  %v5495_v54 = vld [vmem:[%s5186_s12 + $0x84] sm:$0xf] }
  0xbc   : > { %v5466_v19 = vcombine.low %v560_v53, %v570_v15  ;;  %v593_v41 = vrot.slane %v591_v11, 5  ;;  %v1332_v13 = vrot.slane %v1330_v60, 4  ;;  %v2377_v20 = vsel %vm838_vm0, %v5328_v63, 0 }
  0xbd   : > { %6477 = vst [vmem:[#allocation23_spill] sm:$0xff] %v5461_v0  ;;  %v579_v35 = vrot.slane %v578_v23, 4  ;;  %v596_v40 = vshrl.u32 %v5457_v12, 16  ;;  %v588_v42 = vor.u32 %v587_v21, %v583_v24  ;;  %v1331_v47 = vsel %vm5417_vm7, %v3563_v31, %v1330_v60 }
  0xbe   : > { %6478 = vst [vmem:[#allocation24_spill] sm:$0xff] %v5466_v19  ;;  %3924 = vmatprep.mubr.msk.bf16.mxu1 %vm789_vm3, %v5466_v19  ;;  %v599_v49 = vshll.u32 %v5457_v12, 16  ;;  %v605_v50 = vshll.u32 %v5464_v56, 16  ;;  %4057 = vmatmul.mubr.msk.bf16.gmra.mrb[12].mxu0 %vm789_vm3, %v5466_v19  ;;  %v1334_v38 = vsel %vm5417_vm7, %v1332_v13, %v1333_v61  ;;  %v609_v60 = vshrl.u32 %v5464_v56, 16 }
  0xbf   : > { %v584_v63 = vsel %vm5239_vm4, %v579_v35, %v583_v24  ;;  %v598_v53 = vrot.slane %v596_v40, 4  ;;  %4078 = vmatprep.mubr.msk.bf16.mxu0 %vm789_vm3, %v5461_v0  ;;  %v589_v58 = vrot.slane %v588_v42, 4  ;;  %v5499_v11 = vcombine.low %v1331_v47, %v1334_v38  ;;  %v5508_v40 = vld [vmem:[%s5186_s12 + $0x88] sm:$0xf]  ;;  %v5511_v42 = vld [vmem:[%s5186_s12 + $0x8c] sm:$0x1] }
  0xc0   : > { %v601_v15 = vrot.slane %v599_v49, 5  ;;  %v607_v23 = vrot.slane %v605_v50, 5  ;;  %v611_v24 = vrot.slane %v609_v60, 4  ;;  %v615_v43 = vshll.u32 %v5481_v46, 16 }
  0xc1   : > { %6479 = vst [vmem:[#allocation25_spill] sm:$0xff] %v5499_v11  ;;  %v3564_v61 = vrot.slane %v5265_v57, 9  ;;  %v1337_v21 = vrot.slane %v5273_v62, 5  ;;  %v594_v31 = vsel %vm5239_vm4, %v589_v58, %v593_v41  ;;  %v1340_v13 = vrot.slane %v5278_v6, 5 }
  0xc2   : > { %v602_v35 = vor.u32 %v601_v15, %v598_v53  ;;  %v620_v47 = vshrl.u32 %v5495_v54, 16  ;;  %v5514_v49 = vcombine.low %v584_v63, %v594_v31  ;;  %v612_v50 = vor.u32 %v611_v24, %v607_v23  ;;  %v5530_v31 = vld [vmem:[%s5186_s12 + $0x90] sm:$0xf] }
  0xc3   : > { %v617_v38 = vrot.slane %v615_v43, 5  ;;  %v1338_v60 = vsel %vm5417_vm7, %v3564_v61, %v1337_v21  ;;  %v1339_v19 = vrot.slane %v1337_v21, 4  ;;  %v623_v53 = vshll.u32 %v5495_v54, 16 }
  0xc4   : > { %6480 = vst [vmem:[#allocation26_spill] sm:$0xff] %v5514_v49  ;;  %v603_v4 = vrot.slane %v602_v35, 4  ;;  %v622_v41 = vrot.slane %v620_v47, 4  ;;  %3925 = vmatmul.mubr.msk.bf16.gmra.mrb[16].mxu1 %vm789_vm3, %v5514_v49  ;;  %v613_v6 = vrot.slane %v612_v50, 4  ;;  %v629_v58 = vshll.u32 %v5508_v40, 16 }
  0xc5   : > { %v633_v63 = vshrl.u32 %v5508_v40, 16  ;;  %v639_v15 = vshll.u32 %v5511_v42, 16  ;;  %v1341_v43 = vsel %vm5417_vm7, %v1339_v19, %v1340_v13  ;;  %v625_v61 = vrot.slane %v623_v53, 5  ;;  %v5532_v35 = vld [vmem:[#allocation5 + $0xe] sm:$0x3] }
  0xc6   : > { %v608_v24 = vsel %vm5239_vm4, %v603_v4, %v607_v23  ;;  %v3565_v21 = vrot.slane %v5281_v7, 9  ;;  %6481 = vst [vmem:[#allocation27_spill] sm:$0xff] %v5532_v35  ;;  %4079 = vmatmul.mubr.msk.bf16.vlgmr.msra.gmra.mrb[0].mxu0 %vm789_vm3, %v5499_v11  ;;  %v618_v47 = vsel %vm5239_vm4, %v613_v6, %v617_v38  ;;  %v5538_v50 = vcombine.low %v1338_v60, %v1341_v43  ;;  %v5541_v49 = vld [vmem:[%s5186_s12 + $0x94] sm:$0xf]  ;;  %v5550_v38 = vld [vmem:[%s5186_s12 + $0x98] sm:$0x1] }
  0xc7   : > { %v631_v4 = vrot.slane %v629_v58, 5  ;;  %v635_v23 = vrot.slane %v633_v63, 4  ;;  %4111 = vmatpush3.bf16.msra.mxu0 %v2377_v20  ;;  %v5543_v19 = vcombine.low %v608_v24, %v618_v47  ;;  %v626_v13 = vor.u32 %v625_v61, %v622_v41 }
  0xc8   : > { %6482 = vst [vmem:[#allocation28_spill] sm:$0xff] %v5538_v50  ;;  %v641_v53 = vrot.slane %v639_v15, 5  ;;  %v1344_v14 = vrot.slane %v5292_v22, 5  ;;  %4082 = vmatprep.mubr.msk.bf16.mxu0 %vm789_vm3, %v5538_v50  ;;  %v1347_v18 = vrot.slane %v5298_v28, 5  ;;  %v644_v60 = vshrl.u32 %v5530_v31, 16  ;;  %4478 = vmatprep.subr.msk.bf16.mxu0 %vm838_vm0, %v5532_v35 }
  0xc9   : > { %6483 = vst [vmem:[#allocation29_spill] sm:$0xff] %v5543_v19  ;;  %v636_v3 = vor.u32 %v635_v23, %v631_v4  ;;  %v647_v6 = vshll.u32 %v5530_v31, 16  ;;  %3928 = vmatprep.mubr.msk.bf16.mxu1 %vm789_vm3, %v5543_v19  ;;  %v627_v20 = vrot.slane %v626_v13, 4  ;;  %v653_v28 = vshll.u32 %v5541_v49, 16  ;;  %v5575_v19 = vld [vmem:[%s5186_s12 + $0xa0] sm:$0xf] }
  0xca   : > { %v1345_v41 = vsel %vm5417_vm7, %v3565_v21, %v1344_v14  ;;  %v1346_v58 = vrot.slane %v1344_v14, 4  ;;  %v646_v15 = vrot.slane %v644_v60, 4  ;;  %v657_v43 = vshrl.u32 %v5541_v49, 16  ;;  %v5568_v21 = vld [vmem:[%s5186_s12 + $0x9c] sm:$0xf] }
  0xcb   : > { %v637_v63 = vrot.slane %v636_v3, 4  ;;  %v649_v24 = vrot.slane %v647_v6, 5  ;;  %v632_v61 = vsel %vm5239_vm4, %v627_v20, %v631_v4  ;;  %v655_v23 = vrot.slane %v653_v28, 5  ;;  %v5641_v50 = vld [vmem:[%s5186_s12 + $0xb8] sm:$0xf] }
  0xcc   : > { %v1348_v47 = vsel %vm5417_vm7, %v1346_v58, %v1347_v18  ;;  %v663_v13 = vshll.u32 %v5550_v38, 16  ;;  %v659_v6 = vrot.slane %v657_v43, 4  ;;  %v3566_v18 = vrot.slane %v5302_v36, 9 }
  0xcd   : > { %v642_v14 = vsel %vm5239_vm4, %v637_v63, %v641_v53  ;;  %v5572_v3 = vcombine.low %v1345_v41, %v1348_v47  ;;  %v650_v60 = vor.u32 %v649_v24, %v646_v15  ;;  %v1351_v20 = vrot.slane %v5312_v48, 5  ;;  %v5585_v41 = vld [vmem:[%s5186_s12 + $0xa4] sm:$0x1] }
  0xce   : > { %v5577_v37 = vcombine.low %v632_v61, %v642_v14  ;;  %v665_v4 = vrot.slane %v663_v13, 5  ;;  %v660_v28 = vor.u32 %v659_v6, %v655_v23  ;;  %v1354_v53 = vrot.slane %v5315_v52, 5 }
  0xcf   : > { %6484 = vst [vmem:[#allocation30_spill] sm:$0xff] %v5572_v3  ;;  %4083 = vmatmul.mubr.msk.bf16.gmra.mrb[4].mxu0 %vm789_vm3, %v5572_v3  ;;  %v651_v58 = vrot.slane %v650_v60, 4  ;;  %v668_v63 = vshrl.u32 %v5568_v21, 16  ;;  %v1352_v15 = vsel %vm5417_vm7, %v3566_v18, %v1351_v20  ;;  %v1353_v24 = vrot.slane %v1351_v20, 4  ;;  %v5601_v20 = vld [vmem:[%s5186_s12 + $0xa8] sm:$0xf] }
  0xd0   : > { %6485 = vst [vmem:[#allocation31_spill] sm:$0xff] %v5577_v37  ;;  %3929 = vmatmul.mubr.msk.bf16.gmra.mrb[20].mxu1 %vm789_vm3, %v5577_v37  ;;  %v671_v43 = vshll.u32 %v5568_v21, 16  ;;  %v677_v61 = vshll.u32 %v5575_v19, 16  ;;  %v661_v47 = vrot.slane %v660_v28, 4  ;;  %v681_v14 = vshrl.u32 %v5575_v19, 16 }
  0xd1   : > { %v656_v52 = vsel %vm5239_vm4, %v651_v58, %v655_v23  ;;  %v670_v13 = vrot.slane %v668_v63, 4  ;;  %v1355_v60 = vsel %vm5417_vm7, %v1353_v24, %v1354_v53  ;;  %v687_v18 = vshll.u32 %v5585_v41, 16  ;;  %v5609_v28 = vld [vmem:[%s5186_s12 + $0xac] sm:$0xf] }
  0xd2   : > { %v673_v6 = vrot.slane %v671_v43, 5  ;;  %v679_v37 = vrot.slane %v677_v61, 5  ;;  %v666_v10 = vsel %vm5239_vm4, %v661_v47, %v665_v4  ;;  %v5605_v44 = vcombine.low %v1352_v15, %v1355_v60  ;;  %v5618_v4 = vld [vmem:[%s5186_s12 + $0xb0] sm:$0x1] }
  0xd3   : > { %v683_v23 = vrot.slane %v681_v14, 4  ;;  %v3567_v58 = vrot.slane %v5326_v59, 9  ;;  %v5611_v63 = vcombine.low %v656_v52, %v666_v10  ;;  %v689_v24 = vrot.slane %v687_v18, 5 }
  0xd4   : > { %6486 = vst [vmem:[#allocation32_spill] sm:$0xff] %v5605_v44  ;;  %v674_v53 = vor.u32 %v673_v6, %v670_v13  ;;  %v1358_v43 = vrot.slane %v5337_v16, 5  ;;  %4086 = vmatprep.mubr.msk.bf16.mxu0 %vm789_vm3, %v5605_v44  ;;  %v1361_v3 = vrot.slane %v5350_v25, 5  ;;  %v692_v15 = vshrl.u32 %v5601_v20, 16 }
  0xd5   : > { %6487 = vst [vmem:[#allocation33_spill] sm:$0xff] %v5611_v63  ;;  %v684_v61 = vor.u32 %v683_v23, %v679_v37  ;;  %v695_v47 = vshll.u32 %v5601_v20, 16  ;;  %3932 = vmatprep.mubr.msk.bf16.mxu1 %vm789_vm3, %v5611_v63  ;;  %v701_v14 = vshll.u32 %v5609_v28, 16  ;;  %v705_v18 = vshrl.u32 %v5609_v28, 16 }
  0xd6   : > { %v675_v10 = vrot.slane %v674_v53, 4  ;;  %v1359_v52 = vsel %vm5417_vm7, %v3567_v58, %v1358_v43  ;;  %v1360_v13 = vrot.slane %v1358_v43, 4  ;;  %v694_v25 = vrot.slane %v692_v15, 4  ;;  %v5634_v58 = vld [vmem:[%s5186_s12 + $0xb4] sm:$0xf] }
  0xd7   : > { %v685_v60 = vrot.slane %v684_v61, 4  ;;  %v697_v6 = vrot.slane %v695_v47, 5  ;;  %v703_v63 = vrot.slane %v701_v14, 5  ;;  %v711_v53 = vshll.u32 %v5618_v4, 16 }
  0xd8   : > { %v680_v23 = vsel %vm5239_vm4, %v675_v10, %v679_v37  ;;  %v1362_v44 = vsel %vm5417_vm7, %v1360_v13, %v1361_v3  ;;  %v707_v47 = vrot.slane %v705_v18, 4  ;;  %v3568_v3 = vrot.slane %v5354_v27, 9 }
  0xd9   : > { %v690_v43 = vsel %vm5239_vm4, %v685_v60, %v689_v24  ;;  %v5638_v61 = vcombine.low %v1359_v52, %v1362_v44  ;;  %v698_v15 = vor.u32 %v697_v6, %v694_v25  ;;  %v713_v37 = vrot.slane %v711_v53, 5  ;;  %v5651_v44 = vld [vmem:[%s5186_s12 + $0xbc] sm:$0x1] }
  0xda   : > { %v5643_v11 = vcombine.low %v680_v23, %v690_v43  ;;  %v1365_v10 = vrot.slane %v5362_v45, 5  ;;  %v708_v14 = vor.u32 %v707_v47, %v703_v63  ;;  %v1368_v24 = vrot.slane %v5374_v55, 5 }
  0xdb   : > { %6488 = vst [vmem:[#allocation34_spill] sm:$0xff] %v5638_v61  ;;  %4087 = vmatmul.mubr.msk.bf16.gmra.mrb[8].mxu0 %vm789_vm3, %v5638_v61  ;;  %v699_v13 = vrot.slane %v698_v15, 4  ;;  %v716_v52 = vshrl.u32 %v5634_v58, 16  ;;  %v719_v6 = vshll.u32 %v5634_v58, 16  ;;  %v725_v18 = vshll.u32 %v5641_v50, 16 }
  0xdc   : > { %6489 = vst [vmem:[#allocation35_spill] sm:$0xff] %v5643_v11  ;;  %3933 = vmatmul.mubr.msk.bf16.gmra.mrb[24].mxu1 %vm789_vm3, %v5643_v11  ;;  %v1366_v60 = vsel %vm5417_vm7, %v3568_v3, %v1365_v10  ;;  %v1367_v25 = vrot.slane %v1365_v10, 4  ;;  %v709_v53 = vrot.slane %v708_v14, 4  ;;  %v729_v43 = vshrl.u32 %v5641_v50, 16 }
  0xdd   : > { %v704_v23 = vsel %vm5239_vm4, %v699_v13, %v703_v63  ;;  %v718_v55 = vrot.slane %v716_v52, 4  ;;  %v721_v47 = vrot.slane %v719_v6, 5  ;;  %v727_v11 = vrot.slane %v725_v18, 5 }
  0xde   : > { %v1369_v15 = vsel %vm5417_vm7, %v1367_v25, %v1368_v24  ;;  %v735_v61 = vshll.u32 %v5651_v44, 16  ;;  %v714_v3 = vsel %vm5239_vm4, %v709_v53, %v713_v37  ;;  %v731_v0 = vrot.slane %v729_v43, 4 }
  0xdf   : > { %v5668_v10 = vcombine.low %v1366_v60, %v1369_v15  ;;  %v3569_v35 = vrot.slane %v5379_v8, 9  ;;  %v5671_v63 = vcombine.low %v704_v23, %v714_v3  ;;  %v722_v13 = vor.u32 %v721_v47, %v718_v55 }
  0xe0   : > { %v737_v14 = vrot.slane %v735_v61, 5  ;;  %v1372_v52 = vrot.slane %v5385_v17, 5  ;;  %v732_v24 = vor.u32 %v731_v0, %v727_v11  ;;  %v1375_v25 = vrot.slane %v5393_v33, 5 }
  0xe1   : > { %4090 = vmatprep.mubr.msk.bf16.mxu0 %vm789_vm3, %v5668_v10  ;;  %v3570_v6 = vrot.slane %v5404_v51, 9  ;;  %v1379_v37 = vrot.slane %v5426_v26, 5  ;;  %3936 = vmatprep.mubr.msk.bf16.mxu1 %vm789_vm3, %v5671_v63  ;;  %v723_v60 = vrot.slane %v722_v13, 4  ;;  %v1382_v23 = vrot.slane %v5435_v32, 5 }
  0xe2   : > { %v1373_v18 = vsel %vm5417_vm7, %v3569_v35, %v1372_v52  ;;  %v1374_v61 = vrot.slane %v1372_v52, 4  ;;  %v733_v53 = vrot.slane %v732_v24, 4  ;;  %v3529_v0 = vcombine.low %v5201_v2, %v5210_v5 }
  0xe3   : > { %v1380_v33 = vsel %vm5417_vm7, %v3570_v6, %v1379_v37  ;;  %v1381_v55 = vrot.slane %v1379_v37, 4  ;;  %v728_v43 = vsel %vm5239_vm4, %v723_v60, %v727_v11  ;;  %v3571_v47 = vrot.slane %v5457_v12, 9 }
  0xe4   : > { %v1376_v15 = vsel %vm5417_vm7, %v1374_v61, %v1375_v25  ;;  %v1386_v35 = vrot.slane %v5464_v56, 5  ;;  %v738_v32 = vsel %vm5239_vm4, %v733_v53, %v737_v14  ;;  %v1389_v5 = vrot.slane %v5481_v46, 5 }
  0xe5   : > { %v5696_v3 = vcombine.low %v1373_v18, %v1376_v15  ;;  %v1383_v2 = vsel %vm5417_vm7, %v1381_v55, %v1382_v23  ;;  %v5701_v13 = vcombine.low %v728_v43, %v738_v32  ;;  %v3572_v14 = vrot.slane %v5495_v54, 9 }
  0xe6   : > { %v5703_v11 = vcombine.low %v1380_v33, %v1383_v2  ;;  %v1388_v52 = vrot.slane %v1386_v35, 4  ;;  %v1387_v24 = vsel %vm5417_vm7, %v3571_v47, %v1386_v35  ;;  %v1393_v25 = vrot.slane %v5508_v40, 5 }
  0xe7   : > { %4091 = vmatmul.mubr.msk.bf16.gmra.mrb[12].mxu0 %vm789_vm3, %v5696_v3  ;;  %v1396_v6 = vrot.slane %v5511_v42, 5  ;;  %3937 = vmatmul.mubr.msk.bf16.gmra.mrb[28].mxu1 %vm789_vm3, %v5701_v13  ;;  %v1400_v37 = vrot.slane %v5541_v49, 5  ;;  %v3573_v42 = vrot.slane %v5530_v31, 9  ;;  %v1403_v33 = vrot.slane %v5550_v38, 5 }
  0xe8   : > { %4094 = vmatprep.mubr.msk.bf16.mxu0 %vm789_vm3, %v5703_v11  ;;  %v1390_v46 = vsel %vm5417_vm7, %v1388_v52, %v1389_v5  ;;  %3942 = vmatprep.mubr.msk.bf16.mxu1 %vm789_vm3, %v3529_v0  ;;  %v1394_v60 = vsel %vm5417_vm7, %v3572_v14, %v1393_v25  ;;  %v1395_v18 = vrot.slane %v1393_v25, 4  ;;  %v1407_v55 = vrot.slane %v5575_v19, 5 }
  0xe9   : > { %v5722_v61 = vcombine.low %v1387_v24, %v1390_v46  ;;  %v1402_v53 = vrot.slane %v1400_v37, 4  ;;  %v5733_v0 = vcombine.low %v5235_v29, %v5248_v39  ;;  %v3574_v15 = vrot.slane %v5568_v21, 9  ;;  %v5746_v39 = vld [vmem:[#allocation5 + $0x6] sm:$0x3] }
  0xea   : > { %v1397_v23 = vsel %vm5417_vm7, %v1395_v18, %v1396_v6  ;;  %v1409_v47 = vrot.slane %v1407_v55, 4  ;;  %v1410_v35 = vrot.slane %v5585_v41, 5  ;;  %v1525_v32 = vsel %vm838_vm0, %v5409_v1, 0 }
  0xeb   : > { %v5729_v43 = vcombine.low %v1394_v60, %v1397_v23  ;;  %v1414_v2 = vrot.slane %v5609_v28, 5  ;;  %v1401_v38 = vsel %vm5417_vm7, %v3573_v42, %v1400_v37  ;;  %v1404_v29 = vsel %vm5417_vm7, %v1402_v53, %v1403_v33 }
  0xec   : > { %v1421_v1 = vrot.slane %v5641_v50, 5  ;;  %v5757_v41 = vcombine.low %v5265_v57, %v5273_v62  ;;  %v1408_v5 = vsel %vm5417_vm7, %v3574_v15, %v1407_v55  ;;  %v1411_v52 = vsel %vm5417_vm7, %v1409_v47, %v1410_v35 }
  0xed   : > { %v3575_v24 = vrot.slane %v5601_v20, 9  ;;  %v5764_v14 = vcombine.low %v1401_v38, %v1404_v29  ;;  %v1416_v25 = vrot.slane %v1414_v2, 4  ;;  %v1417_v6 = vrot.slane %v5618_v4, 5 }
  0xee   : > { %v5769_v46 = vcombine.low %v5404_v51, %v5426_v26  ;;  %v3576_v57 = vrot.slane %v5634_v58, 9  ;;  %v1424_v62 = vrot.slane %v5651_v44, 5  ;;  %v5777_v37 = vcombine.low %v5457_v12, %v5464_v56  ;;  %v5786_v26 = vld [vmem:[%s5186_s12 + $0xc4] sm:$0xf] }
  0xef   : > { %4095 = vmatmul.mubr.msk.bf16.gmra.mrb[16].mxu0 %vm789_vm3, %v5722_v61  ;;  %3943 = vmatmul.mubr.msk.bf16.vlgmr.msra.gmra.mrb[0].mxu1 %vm789_vm3, %v5245_v34  ;;  %v5781_v60 = vcombine.low %v5495_v54, %v5508_v40  ;;  %v5783_v4 = vcombine.low %v1408_v5, %v1411_v52  ;;  %v1423_v51 = vrot.slane %v1421_v1, 4  ;;  %v5790_v18 = vcombine.low %v5530_v31, %v5541_v49  ;;  %v5813_v49 = vld [vmem:[%s5186_s12 + $0xc0] sm:$0xf] }
  0xf0   : > { %4098 = vmatprep.mubr.msk.bf16.mxu0 %vm789_vm3, %v5729_v43  ;;  %3975 = vmatpush3.bf16.msra.mxu1 %v1525_v32  ;;  %v5794_v44 = vcombine.low %v5568_v21, %v5575_v19  ;;  %v5798_v12 = vcombine.low %v5281_v7, %v5292_v22  ;;  %v5802_v56 = vcombine.low %v5601_v20, %v5609_v28  ;;  %v2157_v31 = vrot.slane %v5786_v26, 5  ;;  %v347_v19 = vld [vmem:[%s5186_s12 + $0xc8] sm:$0x1] }
  0xf1   : > { %3946 = vmatprep.mubr.msk.bf16.mxu1 %vm789_vm3, %v5733_v0  ;;  %4473 = vmatprep.subr.msk.bf16.mxu1 %vm838_vm0, %v5746_v39  ;;  %v5806_v54 = vcombine.low %v5634_v58, %v5641_v50  ;;  %v1415_v40 = vsel %vm5417_vm7, %v3575_v24, %v1414_v2  ;;  %v1418_v7 = vsel %vm5417_vm7, %v1416_v25, %v1417_v6  ;;  %v3643_v20 = vrot.slane %v5813_v49, 9 }
  0xf2   : > { %v1422_v22 = vsel %vm5417_vm7, %v3576_v57, %v1421_v1  ;;  %v1425_v50 = vsel %vm5417_vm7, %v1423_v51, %v1424_v62  ;;  %v5831_v21 = vcombine.low %v5302_v36, %v5312_v48  ;;  %v5834_v28 = vcombine.low %v1415_v40, %v1418_v7 }
  0xf3   : > { %v5836_v58 = vcombine.low %v1422_v22, %v1425_v50  ;;  %v2159_v42 = vrot.slane %v2157_v31, 4  ;;  %v2160_v23 = vrot.slane %v347_v19, 5  ;;  %v1927_v53 = vshrl.u32 %v5813_v49, 16  ;;  %v4730_v22 = vld [vmem:[%s5186_s12] sm:$0xf] }
  0xf4   : > { %v1930_v33 = vshll.u32 %v5813_v49, 16  ;;  %v1936_v55 = vshll.u32 %v5786_v26, 16  ;;  %v1940_v15 = vshrl.u32 %v5786_v26, 16  ;;  %v5844_v36 = vcombine.low %v5326_v59, %v5337_v16 }
  0xf5   : > { %v1929_v48 = vrot.slane %v1927_v53, 4  ;;  %v2158_v2 = vsel %vm5417_vm7, %v3643_v20, %v2157_v31  ;;  %v2161_v59 = vsel %vm5417_vm7, %v2159_v42, %v2160_v23  ;;  %v1946_v29 = vshll.u32 %v347_v19, 16  ;;  %v4729_v31 = vld [vmem:[%s5186_s12 + $0x8] sm:$0x1] }
  0xf6   : > { %v1932_v47 = vrot.slane %v1930_v33, 5  ;;  %v1938_v35 = vrot.slane %v1936_v55, 5  ;;  %v1942_v32 = vrot.slane %v1940_v15, 4  ;;  %v5858_v24 = vcombine.low %v2158_v2, %v2161_v59  ;;  %v6491_v33 = vld [vmem:[#allocation23_spill] sm:$0xff]  ;;  %v6492_v55 = vld [vmem:[#allocation25_spill] sm:$0xff]  ;;  %v6496_v59 = vld [vmem:[#allocation34_spill] sm:$0xff] }
  0xf7   : > { %4099 = vmatmul.mubr.msk.bf16.gmra.mrb[20].mxu0 %vm789_vm3, %v5764_v14  ;;  %3947 = vmatmul.mubr.msk.bf16.gmra.mrb[4].mxu1 %vm789_vm3, %v5757_v41  ;;  %v1948_v52 = vrot.slane %v1946_v29, 5  ;;  %v5862_v25 = vcombine.low %v5354_v27, %v5362_v45  ;;  %v5870_v62 = vcombine.low %v5379_v8, %v5385_v17  ;;  %v6490_v27 = vld [vmem:[#allocation27_spill] sm:$0xff]  ;;  %v1319_v7 = vrot.slane %v4729_v31, 5  ;;  %v4731_v15 = vld [vmem:[#allocation5 + $0x8] sm:$0x3]  ;;  %v6507_v31 = vld [vmem:[#allocation33_spill] sm:$0xff] }
  0xf8   : > { %4102 = vmatprep.mubr.msk.bf16.mxu0 %vm789_vm3, %v5783_v4  ;;  %3950 = vmatprep.mubr.msk.bf16.mxu1 %vm789_vm3, %v5798_v12  ;;  %v1933_v16 = vor.u32 %v1932_v47, %v1929_v48  ;;  %v1943_v38 = vor.u32 %v1942_v32, %v1938_v35  ;;  %v2605_v45 = vsel %vm838_vm0, %v6490_v27, 0  ;;  %v2809_v8 = vld [vmem:[#allocation5 + $0x10] sm:$0x3]  ;;  %v4728_v17 = vld [vmem:[%s5186_s12 + $0x4] sm:$0xf]  ;;  %v3561_v50 = vrot.slane %v4730_v22, 9 }
  0xf9   : > { %v1316_v40 = vrot.slane %v4728_v17, 5  ;;  %v1731_v53 = vsel %vm838_vm0, %v5746_v39, 0  ;;  %v6493_v39 = vld [vmem:[#allocation28_spill] sm:$0xff]  ;;  %v6494_v48 = vld [vmem:[#allocation30_spill] sm:$0xff]  ;;  %v5944_v47 = vcombine.low %v5813_v49, %v5786_v26  ;;  %v6497_v49 = vld [vmem:[#allocation17_spill] sm:$0xff] }
  0xfa   : > { %v1934_v1 = vrot.slane %v1933_v16, 4  ;;  %v1944_v5 = vrot.slane %v1943_v38, 4  ;;  %v5953_v32 = vld [vmem:[%s5186_s12 + $0xcc] sm:$0xf]  ;;  %v5956_v2 = vld [vmem:[%s5186_s12 + $0xd0] sm:$0xf] }
  0xfb   : > { %v1318_v19 = vrot.slane %v1316_v40, 4  ;;  %v1317_v20 = vsel %vm5417_vm7, %v3561_v50, %v1316_v40  ;;  %v3661_v26 = vcombine.low %v5953_v32, %v5956_v2  ;;  %v2817_v16 = vsel %vm838_vm0, %v2809_v8, 0  ;;  %v6498_v38 = vld [vmem:[#allocation18_spill] sm:$0xff]  ;;  %v6499_v29 = vld [vmem:[#allocation19_spill] sm:$0xff]  ;;  %v6505_v27 = vld [vmem:[#allocation29_spill] sm:$0xff] }
  0xfc   : > { %v1939_v6 = vsel %vm5239_vm4, %v1934_v1, %v1938_v35  ;;  %v1949_v57 = vsel %vm5239_vm4, %v1944_v5, %v1948_v52  ;;  %v6495_v35 = vld [vmem:[#allocation32_spill] sm:$0xff]  ;;  %v6501_v5 = vld [vmem:[#allocation21_spill] sm:$0xff]  ;;  %v6502_v52 = vld [vmem:[#allocation22_spill] sm:$0xff]  ;;  %v2576_v17 = vshll.u32 %v5953_v32, 16  ;;  %v2586_v40 = vshrl.u32 %v5956_v2, 16 }
  0xfd   : > { %v5872_v51 = vcombine.low %v1939_v6, %v1949_v57  ;;  %v1320_v42 = vsel %vm5417_vm7, %v1318_v19, %v1319_v7  ;;  %v6500_v1 = vld [vmem:[#allocation20_spill] sm:$0xff]  ;;  %v6504_v57 = vld [vmem:[#allocation26_spill] sm:$0xff]  ;;  %v2582_v7 = vshll.u32 %v5956_v2, 16  ;;  %v2803_v30 = vrot.slane %v5956_v2, 5 }
  0xfe   : > { %v3577_v23 = vcombine.low %v1317_v20, %v1320_v42  ;;  %v6503_v6 = vld [vmem:[#allocation24_spill] sm:$0xff]  ;;  %v2578_v50 = vrot.slane %v2576_v17, 5  ;;  %v2588_v20 = vrot.slane %v2586_v40, 4 }
  0xff   : > { %4103 = vmatmul.mubr.msk.bf16.gmra.mrb[24].mxu0 %vm789_vm3, %v5834_v28  ;;  %3951 = vmatmul.mubr.msk.bf16.gmra.mrb[8].mxu1 %vm789_vm3, %v5831_v21  ;;  %v6508_v22 = vld [vmem:[#allocation16_spill] sm:$0xff]  ;;  %v2584_v19 = vrot.slane %v2582_v7, 5 }
 0x100   : > { %4106 = vmatprep.mubr.msk.bf16.mxu0 %vm789_vm3, %v5836_v58  ;;  %3954 = vmatprep.mubr.msk.bf16.mxu1 %vm789_vm3, %v5844_v36  ;;  %v350_v42 = vld [vmem:[%s5186_s12 + $0xd4] sm:$0x1] }
 0x107   : > { %4107 = vmatmul.mubr.msk.bf16.gmra.mrb[28].mxu0 %vm789_vm3, %v5858_v24  ;;  %3955 = vmatmul.mubr.msk.bf16.gmra.mrb[12].mxu1 %vm789_vm3, %v5862_v25 }
 0x108   : > { %4112 = vmatprep.mubr.msk.bf16.mxu0 %vm789_vm3, %v5733_v0  ;;  %3958 = vmatprep.mubr.msk.bf16.mxu1 %vm789_vm3, %v5870_v62 }
 0x10f   : > { %4113 = vmatmul.mubr.msk.bf16.vlgmr.msra.gmra.mrb[0].mxu0 %vm789_vm3, %v5757_v41  ;;  %3959 = vmatmul.mubr.msk.bf16.gmra.mrb[16].mxu1 %vm789_vm3, %v5769_v46 }
 0x110   : > { %4145 = vmatpush3.bf16.msra.mxu0 %v2605_v45  ;;  %3962 = vmatprep.mubr.msk.bf16.mxu1 %vm789_vm3, %v5777_v37  ;;  %v6506_v45 = vld [vmem:[#allocation31_spill] sm:$0xff] }
 0x111   : > { %4116 = vmatprep.mubr.msk.bf16.mxu0 %vm789_vm3, %v5798_v12  ;;  %4479 = vmatprep.subr.msk.bf16.mxu0 %vm838_vm0, %v2809_v8  ;;  %v2573_v8 = vshrl.u32 %v5953_v32, 16 }
 0x117   : > { %4117 = vmatmul.mubr.msk.bf16.gmra.mrb[4].mxu0 %vm789_vm3, %v5831_v21  ;;  %3963 = vmatmul.mubr.msk.bf16.gmra.mrb[20].mxu1 %vm789_vm3, %v5781_v60 }
 0x118   : > { %4120 = vmatprep.mubr.msk.bf16.mxu0 %vm789_vm3, %v5844_v36  ;;  %3966 = vmatprep.mubr.msk.bf16.mxu1 %vm789_vm3, %v5790_v18 }
 0x11f   : > { %4121 = vmatmul.mubr.msk.bf16.gmra.mrb[8].mxu0 %vm789_vm3, %v5862_v25  ;;  %3967 = vmatmul.mubr.msk.bf16.gmra.mrb[24].mxu1 %vm789_vm3, %v5794_v44 }
 0x120   : > { %4124 = vmatprep.mubr.msk.bf16.mxu0 %vm789_vm3, %v5870_v62  ;;  %3970 = vmatprep.mubr.msk.bf16.mxu1 %vm789_vm3, %v5802_v56 }
 0x127   : > { %4125 = vmatmul.mubr.msk.bf16.gmra.mrb[12].mxu0 %vm789_vm3, %v5769_v46  ;;  %3971 = vmatmul.mubr.msk.bf16.gmra.mrb[28].mxu1 %vm789_vm3, %v5806_v54 }
 0x128   : > { %4128 = vmatprep.mubr.msk.bf16.mxu0 %vm789_vm3, %v5777_v37  ;;  %3976 = vmatprep.mubr.msk.bf16.mxu1 %vm789_vm3, %v3577_v23  ;;  %v6509_v23 = vld [vmem:[#allocation35_spill] sm:$0xff] }
 0x12f   : > { %4129 = vmatmul.mubr.msk.bf16.gmra.mrb[16].mxu0 %vm789_vm3, %v5781_v60  ;;  %3977 = vmatmul.mubr.msk.bf16.vlgmr.msra.gmra.mrb[0].mxu1 %vm789_vm3, %v6491_v33  ;;  %v2592_v33 = vshll.u32 %v350_v42, 16 }
 0x130   : > { %4132 = vmatprep.mubr.msk.bf16.mxu0 %vm789_vm3, %v5790_v18  ;;  %4009 = vmatpush3.bf16.msra.mxu1 %v1731_v53  ;;  %v2589_v53 = vor.u32 %v2588_v20, %v2584_v19 }
 0x131   : > { %3980 = vmatprep.mubr.msk.bf16.mxu1 %vm789_vm3, %v6492_v55  ;;  %4475 = vmatprep.subr.msk.bf16.mxu1 %vm838_vm0, %v4731_v15 }
 0x132   : > { %v2590_v15 = vrot.slane %v2589_v53, 4 }
 0x137   : > { %4133 = vmatmul.mubr.msk.bf16.gmra.mrb[20].mxu0 %vm789_vm3, %v5794_v44  ;;  %3981 = vmatmul.mubr.msk.bf16.gmra.mrb[4].mxu1 %vm789_vm3, %v6493_v39 }
 0x138   : > { %4136 = vmatprep.mubr.msk.bf16.mxu0 %vm789_vm3, %v5802_v56  ;;  %3984 = vmatprep.mubr.msk.bf16.mxu1 %vm789_vm3, %v6494_v48 }
 0x13f   : > { %4137 = vmatmul.mubr.msk.bf16.gmra.mrb[24].mxu0 %vm789_vm3, %v5806_v54  ;;  %3985 = vmatmul.mubr.msk.bf16.gmra.mrb[8].mxu1 %vm789_vm3, %v6495_v35 }
 0x140   : > { %4140 = vmatprep.mubr.msk.bf16.mxu0 %vm789_vm3, %v5944_v47  ;;  %3988 = vmatprep.mubr.msk.bf16.mxu1 %vm789_vm3, %v6496_v59 }
 0x147   : > { %4141 = vmatmul.mubr.msk.bf16.gmra.mrb[28].mxu0 %vm789_vm3, %v3661_v26  ;;  %3989 = vmatmul.mubr.msk.bf16.gmra.mrb[12].mxu1 %vm789_vm3, %v5668_v10  ;;  %v2594_v26 = vrot.slane %v2592_v33, 5 }
 0x148   : > { %4146 = vmatprep.mubr.msk.bf16.mxu0 %vm789_vm3, %v6497_v49  ;;  %3992 = vmatprep.mubr.msk.bf16.mxu1 %vm789_vm3, %v5696_v3 }
 0x149   : > { %v2595_v49 = vsel %vm5239_vm4, %v2590_v15, %v2594_v26 }
 0x14f   : > { %4147 = vmatmul.mubr.msk.bf16.vlgmr.msra.gmra.mrb[0].mxu0 %vm789_vm3, %v6498_v38  ;;  %3993 = vmatmul.mubr.msk.bf16.gmra.mrb[16].mxu1 %vm789_vm3, %v5703_v11 }
 0x150   : > { %4179 = vmatpush3.bf16.msra.mxu0 %v2817_v16  ;;  %3996 = vmatprep.mubr.msk.bf16.mxu1 %vm789_vm3, %v5722_v61 }
 0x151   : > { %4150 = vmatprep.mubr.msk.bf16.mxu0 %vm789_vm3, %v6499_v29 }
 0x157   : > { %4151 = vmatmul.mubr.msk.bf16.gmra.mrb[4].mxu0 %vm789_vm3, %v6500_v1  ;;  %3997 = vmatmul.mubr.msk.bf16.gmra.mrb[20].mxu1 %vm789_vm3, %v5729_v43 }
 0x158   : > { %4154 = vmatprep.mubr.msk.bf16.mxu0 %vm789_vm3, %v6501_v5  ;;  %4000 = vmatprep.mubr.msk.bf16.mxu1 %vm789_vm3, %v5764_v14 }
 0x15f   : > { %4155 = vmatmul.mubr.msk.bf16.gmra.mrb[8].mxu0 %vm789_vm3, %v6502_v52  ;;  %4001 = vmatmul.mubr.msk.bf16.gmra.mrb[24].mxu1 %vm789_vm3, %v5783_v4 }
 0x160   : > { %4158 = vmatprep.mubr.msk.bf16.mxu0 %vm789_vm3, %v6503_v6  ;;  %4004 = vmatprep.mubr.msk.bf16.mxu1 %vm789_vm3, %v5834_v28 }
 0x167   : > { %4159 = vmatmul.mubr.msk.bf16.gmra.mrb[12].mxu0 %vm789_vm3, %v6504_v57  ;;  %4005 = vmatmul.mubr.msk.bf16.gmra.mrb[28].mxu1 %vm789_vm3, %v5836_v58 }
 0x168   : > { %4162 = vmatprep.mubr.msk.bf16.mxu0 %vm789_vm3, %v6505_v27  ;;  %4010 = vmatprep.mubr.msk.bf16.mxu1 %vm789_vm3, %v5245_v34  ;;  %v2575_v34 = vrot.slane %v2573_v8, 4 }
 0x16f   : > { %4163 = vmatmul.mubr.msk.bf16.gmra.mrb[16].mxu0 %vm789_vm3, %v6506_v45  ;;  %4011 = vmatmul.mubr.msk.bf16.vlgmr.msra.gmra.mrb[0].mxu1 %vm789_vm3, %v5733_v0  ;;  %v2579_v0 = vor.u32 %v2578_v50, %v2575_v34 }
 0x170   : > { %4166 = vmatprep.mubr.msk.bf16.mxu0 %vm789_vm3, %v6507_v31  ;;  %4213 = vmatpush3.bf16.msra.mxu1 %v6508_v22 }
 0x171   : > { %4014 = vmatprep.mubr.msk.bf16.mxu1 %vm789_vm3, %v5757_v41  ;;  %v2580_v41 = vrot.slane %v2579_v0, 4 }
 0x177   : > { %4167 = vmatmul.mubr.msk.bf16.gmra.mrb[20].mxu0 %vm789_vm3, %v6509_v23  ;;  %4015 = vmatmul.mubr.msk.bf16.gmra.mrb[4].mxu1 %vm789_vm3, %v5798_v12  ;;  %v2585_v12 = vsel %vm5239_vm4, %v2580_v41, %v2584_v19 }
 0x178   : > { %4170 = vmatprep.mubr.msk.bf16.mxu0 %vm789_vm3, %v5671_v63  ;;  %4018 = vmatprep.mubr.msk.bf16.mxu1 %vm789_vm3, %v5831_v21  ;;  %v3678_v21 = vcombine.low %v2585_v12, %v2595_v49 }
 0x17f   : > { %4171 = vmatmul.mubr.msk.bf16.gmra.mrb[24].mxu0 %vm789_vm3, %v5701_v13  ;;  %4019 = vmatmul.mubr.msk.bf16.gmra.mrb[8].mxu1 %vm789_vm3, %v5844_v36 }
 0x180   : > { %4174 = vmatprep.mubr.msk.bf16.mxu0 %vm789_vm3, %v5872_v51  ;;  %4022 = vmatprep.mubr.msk.bf16.mxu1 %vm789_vm3, %v5862_v25 }
 0x187   : > { %4175 = vmatmul.mubr.msk.bf16.gmra.mrb[28].mxu0 %vm789_vm3, %v3678_v21  ;;  %4023 = vmatmul.mubr.msk.bf16.gmra.mrb[12].mxu1 %vm789_vm3, %v5870_v62 }
 0x188   : > { %4180 = vmatprep.mubr.msk.bf16.mxu0 %vm789_vm3, %v6492_v55  ;;  %4026 = vmatprep.mubr.msk.bf16.mxu1 %vm789_vm3, %v5769_v46 }
 0x18f   : > { %4181 = vmatmul.mubr.msk.bf16.vlgmr.msra.gmra.mrb[0].mxu0 %vm789_vm3, %v6493_v39  ;;  %4027 = vmatmul.mubr.msk.bf16.gmra.mrb[16].mxu1 %vm789_vm3, %v5777_v37 }
 0x190   : > { %4184 = vmatprep.mubr.msk.bf16.mxu0 %vm789_vm3, %v6494_v48  ;;  %4030 = vmatprep.mubr.msk.bf16.mxu1 %vm789_vm3, %v5781_v60  ;;  %v6120_v48 = vld [vmem:[#allocation8] ss:$0 sm:$0xff] }
 0x197   : > { %4185 = vmatmul.mubr.msk.bf16.gmra.mrb[4].mxu0 %vm789_vm3, %v6495_v35  ;;  %4031 = vmatmul.mubr.msk.bf16.gmra.mrb[20].mxu1 %vm789_vm3, %v5790_v18 }
 0x198   : > { %4188 = vmatprep.mubr.msk.bf16.mxu0 %vm789_vm3, %v6496_v59  ;;  %4034 = vmatprep.mubr.msk.bf16.mxu1 %vm789_vm3, %v5794_v44 }
 0x19f   : > { %4189 = vmatmul.mubr.msk.bf16.gmra.mrb[8].mxu0 %vm789_vm3, %v5668_v10  ;;  %4035 = vmatmul.mubr.msk.bf16.gmra.mrb[24].mxu1 %vm789_vm3, %v5802_v56  ;;  %v3695_v10 = vrot.slane %v5953_v32, 9 }
 0x1a0   : > { %4192 = vmatprep.mubr.msk.bf16.mxu0 %vm789_vm3, %v5696_v3  ;;  %4038 = vmatprep.mubr.msk.bf16.mxu1 %vm789_vm3, %v5806_v54  ;;  %v2805_v3 = vrot.slane %v2803_v30, 4 }
 0x1a7   : > { %4193 = vmatmul.mubr.msk.bf16.gmra.mrb[12].mxu0 %vm789_vm3, %v5703_v11  ;;  %4039 = vmatmul.mubr.msk.bf16.gmra.mrb[28].mxu1 %vm789_vm3, %v5944_v47  ;;  %v2806_v11 = vrot.slane %v350_v42, 5 }
 0x1a8   : > { %4196 = vmatprep.mubr.msk.bf16.mxu0 %vm789_vm3, %v5722_v61  ;;  %4060 = vmatprep.mubr.msk.bf16.mxu1 %vm789_vm3, %v6504_v57  ;;  %v2804_v61 = vsel %vm5417_vm7, %v3695_v10, %v2803_v30 }
 0x1af   : > { %4197 = vmatmul.mubr.msk.bf16.gmra.mrb[16].mxu0 %vm789_vm3, %v5729_v43  ;;  %4061 = vmatmul.mubr.msk.bf16.vlgmr.msra.gmra.mrb[16].mxu1 %vm789_vm3, %v6505_v27  ;;  %v2807_v43 = vsel %vm5417_vm7, %v2805_v3, %v2806_v11 }
 0x1b0   : > { %4200 = vmatprep.mubr.msk.bf16.mxu0 %vm789_vm3, %v5764_v14  ;;  %4064 = vmatprep.mubr.msk.bf16.mxu1 %vm789_vm3, %v6506_v45  ;;  %v3696_v14 = vcombine.low %v2804_v61, %v2807_v43 }
 0x1b7   : > { %4201 = vmatmul.mubr.msk.bf16.gmra.mrb[20].mxu0 %vm789_vm3, %v5783_v4  ;;  %4065 = vmatmul.mubr.msk.bf16.gmra.mrb[20].mxu1 %vm789_vm3, %v6507_v31 }
 0x1b8   : > { %4204 = vmatprep.mubr.msk.bf16.mxu0 %vm789_vm3, %v5834_v28  ;;  %4068 = vmatprep.mubr.msk.bf16.mxu1 %vm789_vm3, %v6509_v23 }
 0x1bf   : > { %4205 = vmatmul.mubr.msk.bf16.gmra.mrb[24].mxu0 %vm789_vm3, %v5836_v58  ;;  %4069 = vmatmul.mubr.msk.bf16.gmra.mrb[24].mxu1 %vm789_vm3, %v5671_v63 }
 0x1c0   : > { %4208 = vmatprep.mubr.msk.bf16.mxu0 %vm789_vm3, %v5858_v24  ;;  %4072 = vmatprep.mubr.msk.bf16.mxu1 %vm789_vm3, %v5701_v13 }
 0x1c7   : > { %4209 = vmatmul.mubr.msk.bf16.gmra.mrb[28].mxu0 %vm789_vm3, %v3696_v14  ;;  %4073 = vmatmul.mubr.msk.bf16.gmra.mrb[28].mxu1 %vm789_vm3, %v5872_v51  ;;  %v6118_v51 = vld [vmem:[#allocation7] ss:$0 sm:$0xff] }
 0x242   : > { %v4012_v46 = vpop.f32.mrb[0].mxu1 }
 0x243   : > { %v1767_v63 = vpop.f32.mrb[1].mxu1 }
 0x244   : > { %v4013_v37 = vpop.f32.mrb[2].mxu1 }
 0x245   : > { %v1770_v60 = vpop.f32.mrb[3].mxu1 }
 0x24a   : > { %v4016_v4 = vpop.f32.mrb[4].mxu1 }
 0x24b   : > { %v1783_v18 = vpop.f32.mrb[5].mxu1 }
 0x24c   : > { %v4017_v44 = vpop.f32.mrb[6].mxu1 }
 0x24d   : > { %v1786_v56 = vpop.f32.mrb[7].mxu1 }
 0x252   : > { %v4020_v54 = vpop.f32.mrb[8].mxu1 }
 0x253   : > { %v1799_v9 = vpop.f32.mrb[9].mxu1 }
 0x254   : > { %v4021_v28 = vpop.f32.mrb[10].mxu1 }
 0x255   : > { %v6108_v58 = vpop.f32.mrb[11].mxu1 }
 0x25a   : > { %v6110_v13 = vpop.f32.mrb[12].mxu1 }
 0x25b   : > { %v6112_v36 = vpop.f32.mrb[13].mxu1 }
 0x25c   : > { %v6114_v24 = vpop.f32.mrb[14].mxu1 }
 0x25d   : > { %v6116_v25 = vpop.f32.mrb[15].mxu1 }
 0x262   : > { %v4182_v62 = vpop.f32.mrb[0].mxu0 }
 0x263   : > { %v4214_v55 = vadd.f32 %v4182_v62, %v4012_v46  ;;  %v2853_v39 = vpop.f32.mrb[1].mxu0 }
 0x264   : > { %v4215_v47 = vadd.f32 %v2853_v39, %v1767_v63  ;;  %v4183_v35 = vpop.f32.mrb[2].mxu0 }
 0x265   : > { %v3021_v32 = vmul.f32 %v4214_v55, %v6118_v51  ;;  %v4216_v2 = vadd.f32 %v4183_v35, %v4013_v37  ;;  %v2856_v59 = vpop.f32.mrb[3].mxu0 }
 0x266   : > { %v3019_v16 = vmul.f32 %v4215_v47, %v6118_v51  ;;  %v4217_v38 = vadd.f32 %v2856_v59, %v1770_v60 }
 0x267   : > { %v6125_v29 = vadd.f32 %v6120_v48, %v3021_v32  ;;  %v3022_v1 = vmul.f32 %v4216_v2, %v6118_v51 }
 0x268   : > { %v6129_v5 = vadd.f32 %v6120_v48, %v3019_v16  ;;  %v3020_v52 = vmul.f32 %v4217_v38, %v6118_v51 }
 0x269   : > { %v3717_v6 = vmul.f32 -1.442695, %v6125_v29  ;;  %v6134_v57 = vadd.f32 %v6120_v48, %v3022_v1 }
 0x26a   : > { %v3715_v27 = vmul.f32 -1.442695, %v6129_v5  ;;  %v6138_v45 = vadd.f32 %v6120_v48, %v3020_v52  ;;  %v4186_v8 = vpop.f32.mrb[4].mxu0 }
 0x26b   : > { %4600 = vpow2.f32 %v3717_v6  ;;  %v3718_v17 = vmul.f32 -1.442695, %v6134_v57  ;;  %v4218_v40 = vadd.f32 %v4186_v8, %v4016_v4  ;;  %v2869_v31 = vpop.f32.mrb[5].mxu0 }
 0x26c   : > { %4602 = vpow2.f32 %v3715_v27  ;;  %v3716_v7 = vmul.f32 -1.442695, %v6138_v45  ;;  %v4219_v22 = vadd.f32 %v2869_v31, %v1783_v18  ;;  %v4187_v34 = vpop.f32.mrb[6].mxu0 }
 0x26d   : > { %4604 = vpow2.f32 %v3718_v17  ;;  %v3025_v50 = vmul.f32 %v4218_v40, %v6118_v51  ;;  %v4220_v19 = vadd.f32 %v4187_v34, %v4017_v44  ;;  %v2872_v20 = vpop.f32.mrb[7].mxu0 }
 0x26e   : > { %4606 = vpow2.f32 %v3716_v7  ;;  %v3023_v42 = vmul.f32 %v4219_v22, %v6118_v51  ;;  %v4221_v23 = vadd.f32 %v2872_v20, %v1786_v56 }
 0x26f   : > { %v6145_v0 = vadd.f32 %v6120_v48, %v3025_v50  ;;  %v3026_v53 = vmul.f32 %v4220_v19, %v6118_v51 }
 0x270   : > { %v6149_v33 = vadd.f32 %v6120_v48, %v3023_v42  ;;  %v3024_v41 = vmul.f32 %v4221_v23, %v6118_v51 }
 0x271   : > { %v3721_v15 = vmul.f32 -1.442695, %v6145_v0  ;;  %v6154_v26 = vadd.f32 %v6120_v48, %v3026_v53 }
 0x272   : > { %v3719_v12 = vmul.f32 -1.442695, %v6149_v33  ;;  %v6158_v49 = vadd.f32 %v6120_v48, %v3024_v41  ;;  %v4190_v21 = vpop.f32.mrb[8].mxu0 }
 0x273   : > { %4608 = vpow2.f32 %v3721_v15  ;;  %v3722_v30 = vmul.f32 -1.442695, %v6154_v26  ;;  %v4222_v10 = vadd.f32 %v4190_v21, %v4020_v54  ;;  %v2885_v3 = vpop.f32.mrb[9].mxu0 }
 0x274   : > { %4610 = vpow2.f32 %v3719_v12  ;;  %v3720_v11 = vmul.f32 -1.442695, %v6158_v49  ;;  %v4223_v61 = vadd.f32 %v2885_v3, %v1799_v9  ;;  %v4191_v43 = vpop.f32.mrb[10].mxu0 }
 0x275   : > { %v4601_v14 = vpop.eup %4600  ;;  %4612 = vpow2.f32 %v3722_v30  ;;  %v3029_v46 = vmul.f32 %v4222_v10, %v6118_v51  ;;  %v4224_v63 = vadd.f32 %v4191_v43, %v4021_v28  ;;  %v2888_v37 = vpop.f32.mrb[11].mxu0 }
 0x276   : > { %v4603_v60 = vpop.eup %4602  ;;  %v3188_v4 = vadd.f32 1.0, %v4601_v14  ;;  %4614 = vpow2.f32 %v3720_v11  ;;  %v3027_v18 = vmul.f32 %v4223_v61, %v6118_v51  ;;  %v4225_v44 = vadd.f32 %v2888_v37, %v6108_v58 }
 0x277   : > { %v4605_v56 = vpop.eup %4604  ;;  %v3186_v54 = vadd.f32 1.0, %v4603_v60  ;;  %v6166_v62 = vadd.f32 %v6120_v48, %v3029_v46  ;;  %v3030_v9 = vmul.f32 %v4224_v63, %v6118_v51 }
 0x278   : > { %v4607_v55 = vpop.eup %4606  ;;  %4616 = vrcp.f32 %v3188_v4  ;;  %v3189_v39 = vadd.f32 1.0, %v4605_v56  ;;  %v6170_v28 = vadd.f32 %v6120_v48, %v3027_v18  ;;  %v3028_v47 = vmul.f32 %v4225_v44, %v6118_v51 }
 0x279   : > { %4618 = vrcp.f32 %v3186_v54  ;;  %v3187_v35 = vadd.f32 1.0, %v4607_v55  ;;  %v3725_v32 = vmul.f32 -1.442695, %v6166_v62  ;;  %v6175_v58 = vadd.f32 %v6120_v48, %v3030_v9 }
 0x27a   : > { %4620 = vrcp.f32 %v3189_v39  ;;  %v3723_v2 = vmul.f32 -1.442695, %v6170_v28  ;;  %v6179_v59 = vadd.f32 %v6120_v48, %v3028_v47  ;;  %v4194_v16 = vpop.f32.mrb[12].mxu0 }
 0x27b   : > { %4622 = vrcp.f32 %v3187_v35  ;;  %v3726_v38 = vmul.f32 -1.442695, %v6175_v58  ;;  %v4226_v1 = vadd.f32 %v4194_v16, %v6110_v13  ;;  %v2901_v52 = vpop.f32.mrb[13].mxu0 }
 0x27c   : > { %4624 = vpow2.f32 %v3725_v32  ;;  %v3724_v6 = vmul.f32 -1.442695, %v6179_v59  ;;  %v4227_v27 = vadd.f32 %v2901_v52, %v6112_v36  ;;  %v4195_v8 = vpop.f32.mrb[14].mxu0 }
 0x27d   : > { %v4609_v17 = vpop.eup %4608  ;;  %4626 = vpow2.f32 %v3723_v2  ;;  %v3033_v40 = vmul.f32 %v4226_v1, %v6118_v51  ;;  %v4228_v31 = vadd.f32 %v4195_v8, %v6114_v24  ;;  %v2904_v7 = vpop.f32.mrb[15].mxu0 }
 0x27e   : > { %v4611_v22 = vpop.eup %4610  ;;  %v3192_v34 = vadd.f32 1.0, %v4609_v17  ;;  %4628 = vpow2.f32 %v3726_v38  ;;  %v3031_v13 = vmul.f32 %v4227_v27, %v6118_v51  ;;  %v4229_v50 = vadd.f32 %v2904_v7, %v6116_v25 }
 0x27f   : > { %v4613_v19 = vpop.eup %4612  ;;  %v3190_v20 = vadd.f32 1.0, %v4611_v22  ;;  %4630 = vpow2.f32 %v3724_v6  ;;  %v6191_v36 = vadd.f32 %v6120_v48, %v3033_v40  ;;  %v3034_v42 = vmul.f32 %v4228_v31, %v6118_v51 }
 0x280   : > { %v4615_v23 = vpop.eup %4614  ;;  %4632 = vrcp.f32 %v3192_v34  ;;  %v3193_v24 = vadd.f32 1.0, %v4613_v19  ;;  %v6195_v53 = vadd.f32 %v6120_v48, %v3031_v13  ;;  %v3032_v41 = vmul.f32 %v4229_v50, %v6118_v51 }
 0x281   : > { %4634 = vrcp.f32 %v3190_v20  ;;  %v3191_v15 = vadd.f32 1.0, %v4615_v23  ;;  %v3729_v25 = vmul.f32 -1.442695, %v6191_v36  ;;  %v6200_v12 = vadd.f32 %v6120_v48, %v3034_v42 }
 0x282   : > { %v4617_v21 = vpop.eup %4616  ;;  %4636 = vrcp.f32 %v3193_v24  ;;  %v3727_v30 = vmul.f32 -1.442695, %v6195_v53  ;;  %v6204_v10 = vadd.f32 %v6120_v48, %v3032_v41  ;;  %v4198_v3 = vpop.f32.mrb[16].mxu0 }
 0x283   : > { %v4619_v11 = vpop.eup %4618  ;;  %v3284_v61 = vmul.f32 %v4617_v21, %v6125_v29  ;;  %4638 = vrcp.f32 %v3191_v15  ;;  %v3730_v43 = vmul.f32 -1.442695, %v6200_v12  ;;  %v4062_v14 = vpop.f32.mrb[16].mxu1 }
 0x284   : > { %v2917_v46 = vpop.f32.mrb[17].mxu0  ;;  %v4621_v63 = vpop.eup %4620  ;;  %v3282_v37 = vmul.f32 %v4619_v11, %v6129_v5  ;;  %4640 = vpow2.f32 %v3729_v25  ;;  %v3728_v60 = vmul.f32 -1.442695, %v6204_v10  ;;  %v4230_v4 = vadd.f32 %v4198_v3, %v4062_v14 }
 0x285   : > { %v2059_v18 = vpop.f32.mrb[17].mxu1  ;;  %v4199_v44 = vpop.f32.mrb[18].mxu0  ;;  %3316 = vst [vmem:[%s6212_s25 + $0x10] sm:$0xff] %v3284_v61  ;;  %v3285_v29 = vmul.f32 %v4621_v63, %v6134_v57  ;;  %4642 = vpow2.f32 %v3727_v30 }
 0x286   : > { %v4623_v56 = vpop.eup %4622  ;;  %v4231_v54 = vadd.f32 %v2917_v46, %v2059_v18  ;;  %v4063_v9 = vpop.f32.mrb[18].mxu1  ;;  %3314 = vst [vmem:[%s6212_s25] sm:$0xff] %v3282_v37  ;;  %4644 = vpow2.f32 %v3730_v43  ;;  %v3037_v47 = vmul.f32 %v4230_v4, %v6118_v51 }
 0x287   : > { %v2920_v5 = vpop.f32.mrb[19].mxu0  ;;  %v4625_v55 = vpop.eup %4624  ;;  %v3283_v39 = vmul.f32 %v4623_v56, %v6138_v45  ;;  %v4232_v35 = vadd.f32 %v4199_v44, %v4063_v9  ;;  %3317 = vst [vmem:[%s6212_s25 + $0x18] sm:$0xff] %v3285_v29  ;;  %4646 = vpow2.f32 %v3728_v60 }
 0x288   : > { %v2062_v32 = vpop.f32.mrb[19].mxu1  ;;  %v4627_v2 = vpop.eup %4626  ;;  %v3196_v16 = vadd.f32 1.0, %v4625_v55  ;;  %v3035_v57 = vmul.f32 %v4231_v54, %v6118_v51  ;;  %v6223_v6 = vadd.f32 %v6120_v48, %v3037_v47 }
 0x289   : > { %v4233_v38 = vadd.f32 %v2920_v5, %v2062_v32  ;;  %v4629_v1 = vpop.eup %4628  ;;  %3315 = vst [vmem:[%s6212_s25 + $0x8] sm:$0xff] %v3283_v39  ;;  %v3194_v52 = vadd.f32 1.0, %v4627_v2  ;;  %v3038_v45 = vmul.f32 %v4232_v35, %v6118_v51 }
 0x28a   : > { %v4631_v27 = vpop.eup %4630  ;;  %4648 = vrcp.f32 %v3196_v16  ;;  %v3197_v8 = vadd.f32 1.0, %v4629_v1  ;;  %v6227_v17 = vadd.f32 %v6120_v48, %v3035_v57  ;;  %v3733_v22 = vmul.f32 -1.442695, %v6223_v6  ;;  %v4202_v13 = vpop.f32.mrb[20].mxu0 }
 0x28b   : > { %v3036_v40 = vmul.f32 %v4233_v38, %v6118_v51  ;;  %v4633_v31 = vpop.eup %4632  ;;  %4650 = vrcp.f32 %v3194_v52  ;;  %v3195_v7 = vadd.f32 1.0, %v4631_v27  ;;  %v6232_v34 = vadd.f32 %v6120_v48, %v3038_v45  ;;  %v4066_v23 = vpop.f32.mrb[20].mxu1 }
 0x28c   : > { %v4635_v50 = vpop.eup %4634  ;;  %v3288_v19 = vmul.f32 %v4633_v31, %v6145_v0  ;;  %4652 = vrcp.f32 %v3197_v8  ;;  %v3731_v20 = vmul.f32 -1.442695, %v6227_v17  ;;  %v2933_v24 = vpop.f32.mrb[21].mxu0  ;;  %v4234_v21 = vadd.f32 %v4202_v13, %v4066_v23 }
 0x28d   : > { %v6237_v42 = vadd.f32 %v6120_v48, %v3036_v40  ;;  %v4637_v41 = vpop.eup %4636  ;;  %v3286_v15 = vmul.f32 %v4635_v50, %v6149_v33  ;;  %4654 = vrcp.f32 %v3195_v7  ;;  %v3734_v25 = vmul.f32 -1.442695, %v6232_v34  ;;  %v2075_v30 = vpop.f32.mrb[21].mxu1 }
 0x28e   : > { %v4203_v3 = vpop.f32.mrb[22].mxu0  ;;  %v4639_v11 = vpop.eup %4638  ;;  %3320 = vst [vmem:[%s6212_s25 + $0x30] sm:$0xff] %v3288_v19  ;;  %v3289_v0 = vmul.f32 %v4637_v41, %v6154_v26  ;;  %4656 = vpow2.f32 %v3733_v22  ;;  %v4235_v43 = vadd.f32 %v2933_v24, %v2075_v30  ;;  %v3041_v37 = vmul.f32 %v4234_v21, %v6118_v51 }
 0x28f   : > { %v3732_v61 = vmul.f32 -1.442695, %v6237_v42  ;;  %v4067_v14 = vpop.f32.mrb[22].mxu1  ;;  %v2936_v46 = vpop.f32.mrb[23].mxu0  ;;  %3318 = vst [vmem:[%s6212_s25 + $0x20] sm:$0xff] %v3286_v15  ;;  %v3287_v33 = vmul.f32 %v4639_v11, %v6158_v49  ;;  %4658 = vpow2.f32 %v3731_v20 }
 0x290   : > { %v4641_v63 = vpop.eup %4640  ;;  %v4236_v60 = vadd.f32 %v4203_v3, %v4067_v14  ;;  %v2078_v4 = vpop.f32.mrb[23].mxu1  ;;  %3321 = vst [vmem:[%s6212_s25 + $0x38] sm:$0xff] %v3289_v0  ;;  %4660 = vpow2.f32 %v3734_v25  ;;  %v3039_v26 = vmul.f32 %v4235_v43, %v6118_v51  ;;  %v6251_v9 = vadd.f32 %v6120_v48, %v3041_v37 }
 0x291   : > { %v4643_v18 = vpop.eup %4642  ;;  %v3200_v44 = vadd.f32 1.0, %v4641_v63  ;;  %v4237_v56 = vadd.f32 %v2936_v46, %v2078_v4  ;;  %3319 = vst [vmem:[%s6212_s25 + $0x28] sm:$0xff] %v3287_v33  ;;  %4662 = vpow2.f32 %v3732_v61 }
 0x292   : > { %v4645_v29 = vpop.eup %4644  ;;  %v3198_v54 = vadd.f32 1.0, %v4643_v18  ;;  %v3042_v49 = vmul.f32 %v4236_v60, %v6118_v51  ;;  %v6255_v39 = vadd.f32 %v6120_v48, %v3039_v26  ;;  %v3737_v32 = vmul.f32 -1.442695, %v6251_v9  ;;  %v4206_v16 = vpop.f32.mrb[24].mxu0 }
 0x293   : > { %v4647_v5 = vpop.eup %4646  ;;  %4664 = vrcp.f32 %v3200_v44  ;;  %v3201_v55 = vadd.f32 1.0, %v4645_v29  ;;  %v3040_v47 = vmul.f32 %v4237_v56, %v6118_v51  ;;  %v4070_v52 = vpop.f32.mrb[24].mxu1 }
 0x294   : > { %4666 = vrcp.f32 %v3198_v54  ;;  %v3199_v35 = vadd.f32 1.0, %v4647_v5  ;;  %v6260_v2 = vadd.f32 %v6120_v48, %v3042_v49  ;;  %v4649_v57 = vpop.eup %4648  ;;  %v3735_v38 = vmul.f32 -1.442695, %v6255_v39  ;;  %v2949_v45 = vpop.f32.mrb[25].mxu0 }
 0x295   : > { %4668 = vrcp.f32 %v3201_v55  ;;  %v6264_v1 = vadd.f32 %v6120_v48, %v3040_v47  ;;  %v4651_v27 = vpop.eup %4650  ;;  %v3292_v8 = vmul.f32 %v4649_v57, %v6166_v62  ;;  %v4238_v31 = vadd.f32 %v4206_v16, %v4070_v52  ;;  %v2091_v7 = vpop.f32.mrb[25].mxu1 }
 0x296   : > { %4670 = vrcp.f32 %v3199_v35  ;;  %v3738_v40 = vmul.f32 -1.442695, %v6260_v2  ;;  %v4207_v22 = vpop.f32.mrb[26].mxu0  ;;  %v4653_v13 = vpop.eup %4652  ;;  %v3290_v50 = vmul.f32 %v4651_v27, %v6170_v28  ;;  %v4239_v20 = vadd.f32 %v2949_v45, %v2091_v7 }
 0x297   : > { %4672 = vpow2.f32 %v3737_v32  ;;  %v3736_v19 = vmul.f32 -1.442695, %v6264_v1  ;;  %v4071_v23 = vpop.f32.mrb[26].mxu1  ;;  %v2952_v24 = vpop.f32.mrb[27].mxu0  ;;  %3324 = vst [vmem:[%s6212_s25 + $0x50] sm:$0xff] %v3292_v8  ;;  %v3293_v62 = vmul.f32 %v4653_v13, %v6175_v58  ;;  %v3045_v15 = vmul.f32 %v4238_v31, %v6118_v51 }
 0x298   : > { %v4655_v41 = vpop.eup %4654  ;;  %4674 = vpow2.f32 %v3735_v38  ;;  %v4240_v25 = vadd.f32 %v4207_v22, %v4071_v23  ;;  %v2094_v21 = vpop.f32.mrb[27].mxu1  ;;  %3322 = vst [vmem:[%s6212_s25 + $0x40] sm:$0xff] %v3290_v50  ;;  %v3043_v3 = vmul.f32 %v4239_v20, %v6118_v51 }
 0x299   : > { %v4657_v30 = vpop.eup %4656  ;;  %v3291_v28 = vmul.f32 %v4655_v41, %v6179_v59  ;;  %4676 = vpow2.f32 %v3738_v40  ;;  %v4241_v11 = vadd.f32 %v2952_v24, %v2094_v21  ;;  %3325 = vst [vmem:[%s6212_s25 + $0x58] sm:$0xff] %v3293_v62  ;;  %v6278_v58 = vadd.f32 %v6120_v48, %v3045_v15 }
 0x29a   : > { %v4659_v0 = vpop.eup %4658  ;;  %v3204_v61 = vadd.f32 1.0, %v4657_v30  ;;  %4678 = vpow2.f32 %v3736_v19  ;;  %v3046_v43 = vmul.f32 %v4240_v25, %v6118_v51  ;;  %v6283_v63 = vadd.f32 %v6120_v48, %v3043_v3  ;;  %v4210_v18 = vpop.f32.mrb[28].mxu0 }
 0x29b   : > { %v4661_v14 = vpop.eup %4660  ;;  %3323 = vst [vmem:[%s6212_s25 + $0x48] sm:$0xff] %v3291_v28  ;;  %v3202_v46 = vadd.f32 1.0, %v4659_v0  ;;  %v3044_v59 = vmul.f32 %v4241_v11, %v6118_v51  ;;  %v3741_v60 = vmul.f32 -1.442695, %v6278_v58  ;;  %v4074_v54 = vpop.f32.mrb[28].mxu1 }
 0x29c   : > { %v4663_v33 = vpop.eup %4662  ;;  %4680 = vrcp.f32 %v3204_v61  ;;  %v3205_v37 = vadd.f32 1.0, %v4661_v14  ;;  %v6288_v4 = vadd.f32 %v6120_v48, %v3046_v43  ;;  %v3739_v56 = vmul.f32 -1.442695, %v6283_v63  ;;  %v2965_v49 = vpop.f32.mrb[29].mxu0 }
 0x29d   : > { %v4665_v44 = vpop.eup %4664  ;;  %4682 = vrcp.f32 %v3202_v46  ;;  %v3203_v26 = vadd.f32 1.0, %v4663_v33  ;;  %v6292_v29 = vadd.f32 %v6120_v48, %v3044_v59  ;;  %v4242_v35 = vadd.f32 %v4210_v18, %v4074_v54  ;;  %v2107_v32 = vpop.f32.mrb[29].mxu1 }
 0x29e   : > { %v4667_v5 = vpop.eup %4666  ;;  %v3296_v55 = vmul.f32 %v4665_v44, %v6191_v36  ;;  %4684 = vrcp.f32 %v3205_v37  ;;  %v3742_v47 = vmul.f32 -1.442695, %v6288_v4  ;;  %v4211_v16 = vpop.f32.mrb[30].mxu0  ;;  %v4243_v45 = vadd.f32 %v2965_v49, %v2107_v32 }
 0x29f   : > { %v4669_v57 = vpop.eup %4668  ;;  %v3294_v38 = vmul.f32 %v4667_v5, %v6195_v53  ;;  %4686 = vrcp.f32 %v3203_v26  ;;  %v3740_v52 = vmul.f32 -1.442695, %v6292_v29  ;;  %v4075_v27 = vpop.f32.mrb[30].mxu1  ;;  %v3049_v31 = vmul.f32 %v4242_v35, %v6118_v51 }
 0x2a0   : > { %v2968_v8 = vpop.f32.mrb[31].mxu0  ;;  %v4671_v40 = vpop.eup %4670  ;;  %3328 = vst [vmem:[%s6212_s25 + $0x70] sm:$0xff] %v3296_v55  ;;  %v3297_v36 = vmul.f32 %v4669_v57, %v6200_v12  ;;  %4688 = vpow2.f32 %v3741_v60  ;;  %v4244_v7 = vadd.f32 %v4211_v16, %v4075_v27  ;;  %v3047_v50 = vmul.f32 %v4243_v45, %v6118_v51 }
 0x2a1   : > { %v2110_v22 = vpop.f32.mrb[31].mxu1  ;;  %v4673_v13 = vpop.eup %4672  ;;  %3326 = vst [vmem:[%s6212_s25 + $0x60] sm:$0xff] %v3294_v38  ;;  %v3295_v53 = vmul.f32 %v4671_v40, %v6204_v10  ;;  %4690 = vpow2.f32 %v3739_v56  ;;  %v6306_v12 = vadd.f32 %v6120_v48, %v3049_v31 }
 0x2a2   : > { %v4245_v19 = vadd.f32 %v2968_v8, %v2110_v22  ;;  %v4675_v20 = vpop.eup %4674  ;;  %3329 = vst [vmem:[%s6212_s25 + $0x78] sm:$0xff] %v3297_v36  ;;  %v3208_v23 = vadd.f32 1.0, %v4673_v13  ;;  %4692 = vpow2.f32 %v3742_v47  ;;  %v3050_v24 = vmul.f32 %v4244_v7, %v6118_v51 }
 0x2a3   : > { %v4677_v41 = vpop.eup %4676  ;;  %3327 = vst [vmem:[%s6212_s25 + $0x68] sm:$0xff] %v3295_v53  ;;  %v3206_v62 = vadd.f32 1.0, %v4675_v20  ;;  %4694 = vpow2.f32 %v3740_v52  ;;  %v6311_v15 = vadd.f32 %v6120_v48, %v3047_v50  ;;  %v3745_v30 = vmul.f32 -1.442695, %v6306_v12 }
 0x2a4   : > { %v3048_v10 = vmul.f32 %v4245_v19, %v6118_v51  ;;  %v4679_v25 = vpop.eup %4678  ;;  %4696 = vrcp.f32 %v3208_v23  ;;  %v3209_v21 = vadd.f32 1.0, %v4677_v41  ;;  %v6316_v28 = vadd.f32 %v6120_v48, %v3050_v24 }
 0x2a5   : > { %4698 = vrcp.f32 %v3206_v62  ;;  %v3207_v3 = vadd.f32 1.0, %v4679_v25  ;;  %v3743_v11 = vmul.f32 -1.442695, %v6311_v15 }
 0x2a6   : > { %v6320_v0 = vadd.f32 %v6120_v48, %v3048_v10  ;;  %v4681_v61 = vpop.eup %4680  ;;  %4700 = vrcp.f32 %v3209_v21  ;;  %v3746_v51 = vmul.f32 -1.442695, %v6316_v28 }
 0x2a7   : > { %v4683_v43 = vpop.eup %4682  ;;  %v3300_v14 = vmul.f32 %v4681_v61, %v6223_v6  ;;  %4702 = vrcp.f32 %v3207_v3 }
 0x2a8   : > { %v3744_v46 = vmul.f32 -1.442695, %v6320_v0  ;;  %v4685_v59 = vpop.eup %4684  ;;  %v3298_v33 = vmul.f32 %v4683_v43, %v6227_v17  ;;  %4704 = vpow2.f32 %v3745_v30 }
 0x2a9   : > { %v4687_v37 = vpop.eup %4686  ;;  %3332 = vst [vmem:[%s6212_s25 + $0x90] sm:$0xff] %v3300_v14  ;;  %v3301_v48 = vmul.f32 %v4685_v59, %v6232_v34  ;;  %4706 = vpow2.f32 %v3743_v11 }
 0x2aa   : > { %v4689_v60 = vpop.eup %4688  ;;  %3330 = vst [vmem:[%s6212_s25 + $0x80] sm:$0xff] %v3298_v33  ;;  %v3299_v18 = vmul.f32 %v4687_v37, %v6237_v42  ;;  %4708 = vpow2.f32 %v3746_v51 }
 0x2ab   : > { %v4691_v44 = vpop.eup %4690  ;;  %3333 = vst [vmem:[%s6212_s25 + $0x98] sm:$0xff] %v3301_v48  ;;  %v3212_v6 = vadd.f32 1.0, %v4689_v60  ;;  %4710 = vpow2.f32 %v3744_v46 }
 0x2ac   : > { %v4693_v26 = vpop.eup %4692  ;;  %3331 = vst [vmem:[%s6212_s25 + $0x88] sm:$0xff] %v3299_v18  ;;  %v3210_v56 = vadd.f32 1.0, %v4691_v44 }
 0x2ad   : > { %v4695_v17 = vpop.eup %4694  ;;  %4712 = vrcp.f32 %v3212_v6  ;;  %v3213_v54 = vadd.f32 1.0, %v4693_v26 }
 0x2ae   : > { %v4697_v49 = vpop.eup %4696  ;;  %4714 = vrcp.f32 %v3210_v56  ;;  %v3211_v34 = vadd.f32 1.0, %v4695_v17 }
 0x2af   : > { %v4699_v5 = vpop.eup %4698  ;;  %v3304_v42 = vmul.f32 %v4697_v49, %v6251_v9  ;;  %4716 = vrcp.f32 %v3213_v54 }
 0x2b0   : > { %v4701_v55 = vpop.eup %4700  ;;  %v3302_v47 = vmul.f32 %v4699_v5, %v6255_v39  ;;  %4718 = vrcp.f32 %v3211_v34 }
 0x2b1   : > { %v4703_v35 = vpop.eup %4702  ;;  %3336 = vst [vmem:[%s6212_s25 + $0xb0] sm:$0xff] %v3304_v42  ;;  %v3305_v32 = vmul.f32 %v4701_v55, %v6260_v2 }
 0x2b2   : > { %v4705_v16 = vpop.eup %4704  ;;  %3334 = vst [vmem:[%s6212_s25 + $0xa0] sm:$0xff] %v3302_v47  ;;  %v3303_v57 = vmul.f32 %v4703_v35, %v6264_v1 }
 0x2b3   : > { %v4707_v38 = vpop.eup %4706  ;;  %3337 = vst [vmem:[%s6212_s25 + $0xb8] sm:$0xff] %v3305_v32  ;;  %v3216_v52 = vadd.f32 1.0, %v4705_v16 }
 0x2b4   : > { %v4709_v45 = vpop.eup %4708  ;;  %3335 = vst [vmem:[%s6212_s25 + $0xa8] sm:$0xff] %v3303_v57  ;;  %v3214_v9 = vadd.f32 1.0, %v4707_v38 }
 0x2b5   : > { %v4711_v27 = vpop.eup %4710  ;;  %4720 = vrcp.f32 %v3216_v52  ;;  %v3217_v39 = vadd.f32 1.0, %v4709_v45 }
 0x2b6   : > { %4722 = vrcp.f32 %v3214_v9  ;;  %v3215_v8 = vadd.f32 1.0, %v4711_v27 }
 0x2b7   : > { %v4713_v2 = vpop.eup %4712  ;;  %4724 = vrcp.f32 %v3217_v39 }
 0x2b8   : > { %v4715_v1 = vpop.eup %4714  ;;  %v3308_v40 = vmul.f32 %v4713_v2, %v6278_v58  ;;  %4726 = vrcp.f32 %v3215_v8 }
 0x2b9   : > { %v4717_v36 = vpop.eup %4716  ;;  %v3306_v31 = vmul.f32 %v4715_v1, %v6283_v63 }
 0x2ba   : > { %v4719_v7 = vpop.eup %4718  ;;  %3340 = vst [vmem:[%s6212_s25 + $0xd0] sm:$0xff] %v3308_v40  ;;  %v3309_v22 = vmul.f32 %v4717_v36, %v6288_v4 }
 0x2bb   : > { %3338 = vst [vmem:[%s6212_s25 + $0xc0] sm:$0xff] %v3306_v31  ;;  %v3307_v13 = vmul.f32 %v4719_v7, %v6292_v29 }
 0x2bc   : > { %3341 = vst [vmem:[%s6212_s25 + $0xd8] sm:$0xff] %v3309_v22 }
 0x2bd   : > { %3339 = vst [vmem:[%s6212_s25 + $0xc8] sm:$0xff] %v3307_v13 }
 0x2bf   : > { %v4721_v53 = vpop.eup %4720 }
 0x2c0   : > { %v4723_v58 = vpop.eup %4722  ;;  %v3312_v63 = vmul.f32 %v4721_v53, %v6306_v12 }
 0x2c1   : > { %v4725_v50 = vpop.eup %4724  ;;  %v3310_v19 = vmul.f32 %v4723_v58, %v6311_v15 }
 0x2c2   : > { %v4727_v4 = vpop.eup %4726  ;;  %3344 = vst [vmem:[%s6212_s25 + $0xf0] sm:$0xff] %v3312_v63  ;;  %v3313_v20 = vmul.f32 %v4725_v50, %v6316_v28 }
 0x2c3   : > { %3342 = vst [vmem:[%s6212_s25 + $0xe0] sm:$0xff] %v3310_v19  ;;  %v3311_v29 = vmul.f32 %v4727_v4, %v6320_v0 }
 0x2c4   : > { %3345 = vst [vmem:[%s6212_s25 + $0xf8] sm:$0xff] %v3313_v20 }
 0x2c5   : > { %3343 = vst [vmem:[%s6212_s25 + $0xe8] sm:$0xff] %v3311_v29 }
 0x2c6   : > { %4859 = shalt.err (!%p4856_p0)
}
 0x2c7   : > { %s4860_s29 = scalar_lea.hbm %s6357_s6, 4096  ;;  %s4864_s10 = scalar_lea.hbm %s6416_s4, 8192 }
 0x2c8   : > { %p4861_p4 = scmp.ne.s32.totalorder %s6357_s6, %s4860_s29  ;;  %p4865_p12 = scmp.lt.u32.totalorder %s6357_s6, %s6416_s4 }
 0x2c9   : > { %p4866_p1 = scmp.lt.u32.totalorder %s4864_s10, %s4860_s29  ;;  %p4868_p13 = scmp.lt.u32.totalorder %s4860_s29, %s6357_s6 }
 0x2ca   : > { %p4862_p2 = pnand %p4861_p4, %p5126_p10 }
 0x2cb   : > { %p4867_p11 = por %p4866_p1, %p4865_p12 }
 0x2cc   : > { %p4863_p8 = pneg %p4862_p2 }
 0x2cd   : > { %p4869_p6 = por %p4868_p13, %p4867_p11 }
 0x2cf   : > { %p4870_p3 = pnand %p4869_p6, %p4863_p8 }
 0x2d1   : > { %4873 = shalt.err (!%p4870_p3)
}
 0x2d2   : > { %s4947_s25 = smov 128   ;;  %s4948_s27 = smov 8  }
 0x2d3   : > { %4497 = dma.vmem_to_hbm [thread:$0]  (%p5126_p10), %s6359_s11, 4096, %s6357_s6, %s3347_s18, %s4947_s25, %s4947_s25, %s4948_s27  }
 0x2d4 PF: > { %s6510_s21 = sld [smem:[#allocation15_spill]]  ;;  %s3377_s28 = sand.u32 1, %s4916_s15  }
 0x2d5   : > { %p6512_p7 = scmp.ge.s32.totalorder %s4936_s20, 2  ;;  %s3378_s7 = scalar_lea.sflag [#allocation4], %s3377_s28 }
 0x2da   : > { %p6511_p5 = scmp.ne.s32.totalorder %s6510_s21, 0 }
 0x2dc   : > { %p4514_p9 = pnand %p6512_p7, %p6511_p5 }
 0x2de   : > { %4911 = dma.done.wait (!%p4514_p9), %s3378_s7, 4096  }
 0x2df   : > { %4913 = vsyncadd (!%p4514_p9), %s3378_s7, 4294963200  ;;  %s22_s20 = sadd.s32 1, %s4936_s20   ;;  %s6513_s15 = smov %s4920_s16 }
 0x2e0   : > { %p19_p0 = scmp.ge.s32.totalorder %s22_s20, 4   ;;  %s6514_s16 = smov %s4924_s17 }
 0x2e1   : > { %s6515_s17 = smov %s5142_s24  ;;  %s6516_s18 = smov %s4932_s19 }
 0x2e2   : > { %s6517_s19 = smov %s6519_s26  ;;  %21 = sbr.rel (!%p19_p0) target bundleno = 8 (0x8), region = 104 }
 0x2e9   :  { %3383 = vsyncpa [#allocation3], 1 }
 0x2ea   :  { %3385 = vsyncpa [#allocation3 + $0x1], 1 }
 0x2eb   :  { %3386 = vsyncpa [#allocation6], 1 }
 0x2ec   :  { %3387 = vsyncpa [#allocation9], 1 }
 0x2ed   :  { %3388 = vsyncpa [#allocation4], 1 }
 0x2ee   :  { %3390 = vsyncpa [#allocation4 + $0x1], 1 }

</bundles_post_ra>
